<compile_context>
chip_gen: v7x
topology: tpu7x:2x2x1
jax: 0.10.0
libtpu: 0.0.40
codegen_flags: <defaults>
</compile_context>

<pallas_src>
import functools

import jax
import jax.numpy as jnp
from jax.experimental import pallas as pl
from jax.experimental.pallas import tpu as pltpu

EPS = 1e-5


# --------------------------- one-time weight packing --------------------------
def pack_residual_params(w1, w2, w3, g1, be1, g2, be2, g3, be3, W):
    """Pack weights / BN params into lane-dense slabs.

    Hoisted out of the per-forward path (perf review): call once per weight
    update; the returned arrays are reused by every residual_forward call.
    w1: (Cin, Cm), w2: (3, 3, Cm, Cm) HWIO, w3: (Cm, Cout).
    """
    eye_w = jnp.eye(W, dtype=jnp.float32)
    # 1x1 convs as block-diagonal matmuls acting on the packed (w, c) lane axis.
    w1_big = jnp.kron(eye_w, w1).astype(jnp.bfloat16)                # (W*Cin, W*Cm)
    w3_big = jnp.kron(eye_w, w3).astype(jnp.bfloat16)                # (W*Cm, W*Cout)
    # 3x3 conv: kw taps folded into a banded weight per kh, stacked along K.
    # B_kh[w_in*Cm+ci, w_out*Cm+co] = w2[kh, w_in-w_out+1, ci, co] (0 off-band).
    w2_band = jnp.concatenate(
        [sum(jnp.kron(jnp.eye(W, k=1 - kw, dtype=jnp.float32), w2[kh, kw])
             for kw in range(3))
         for kh in range(3)], axis=0).astype(jnp.bfloat16)           # (3*W*Cm, W*Cm)

    def pack(v):  # per-channel BN param -> packed (1, W*C) lane row
        return jnp.tile(v.astype(jnp.float32), W)[None, :]

    return dict(w1=w1_big, w2=w2_band, w3=w3_big,
                g1=pack(g1), be1=pack(be1), g2=pack(g2), be2=pack(be2),
                g3=pack(g3), be3=pack(be3))


# ----------------------------------- kernel ----------------------------------
def _residual_kernel(x_ref, w1_ref, w2_ref, w3_ref,
                     g1_ref, be1_ref, g2_ref, be2_ref, g3_ref, be3_ref,
                     out_ref, *, N, H, W, Cm, Cout):
    NH = N * H
    inv_cnt = 1.0 / float(N * H * W)

    def bn_fused(y, C, g_ref, b_ref, relu):
        # One-pass batch stats (E[y^2]-E[y]^2), folded to a single scale/shift.
        # Per-channel totals broadcast over w via log2(W) lane roll-adds (XLU),
        # replacing the old f32 "sum-and-broadcast" matmul (perf review).
        s = jnp.concatenate([jnp.sum(y, axis=0, keepdims=True),
                             jnp.sum(y * y, axis=0, keepdims=True)],
                            axis=0)                                  # (2, W*C)
        step = C
        while step < W * C:                                          # W is 2^k
            s = s + pltpu.roll(s, shift=step, axis=1)
            step *= 2
        mean = s[0:1] * inv_cnt
        var = s[1:2] * inv_cnt - mean * mean       # biased, as PyTorch fwd
        scale = g_ref[...] * jax.lax.rsqrt(var + EPS)
        shift = b_ref[...] - mean * scale
        z = y * scale + shift
        return jnp.maximum(z, 0.0) if relu else z

    x = x_ref[...]                                                   # (NH, W*Cin) f32

    # ---- conv1 (1x1) + bn1 + relu: block-diag lane-dense matmul --------------
    o1 = jnp.dot(x.astype(jnp.bfloat16), w1_ref[...],
                 preferred_element_type=jnp.float32)                 # (NH, W*Cm) f32
    o1 = bn_fused(o1, Cm, g1_ref, be1_ref, True)

    # ---- conv2 (3x3, stride 1, pad 1) + bn2 + relu ----------------------------
    # kh = -1/0/+1 as +-1-row sublane rolls (XLU), zeroed at image borders via an
    # (NH, 1) iota mask; kw lives inside the banded weight -> one K=3*W*Cm matmul.
    h_col = jax.lax.broadcasted_iota(jnp.int32, (NH, 1), 0) % H
    up = pltpu.roll(o1, shift=1, axis=0)         # row r <- o1[r-1] (cyclic)
    dn = pltpu.roll(o1, shift=NH - 1, axis=0)    # row r <- o1[r+1] (cyclic)
    up = jnp.where(h_col == 0, 0.0, up)          # h-1 outside image
    dn = jnp.where(h_col == H - 1, 0.0, dn)      # h+1 outside image
    lhs = jnp.concatenate([up.astype(jnp.bfloat16),
                           o1.astype(jnp.bfloat16),
                           dn.astype(jnp.bfloat16)], axis=1)         # (NH, 3*W*Cm) bf16
    o2 = jnp.dot(lhs, w2_ref[...], preferred_element_type=jnp.float32)
    o2 = bn_fused(o2, Cm, g2_ref, be2_ref, True)

    # ---- conv3 (1x1) + bn3, identity shortcut, relu ---------------------------
    o3 = jnp.dot(o2.astype(jnp.bfloat16), w3_ref[...],
                 preferred_element_type=jnp.float32)                 # (NH, W*Cout)
    o3 = bn_fused(o3, Cout, g3_ref, be3_ref, False)
    out_ref[...] = jnp.maximum(o3 + x, 0.0)                          # lane-dense store


# ---------------------------------- wrapper -----------------------------------
@jax.jit
def residual_forward(x_nhwc, packed):
    """x_nhwc: (N,H,W,Cin) f32; packed: output of pack_residual_params."""
    N, H, W, Cin = x_nhwc.shape
    Cm = packed["w2"].shape[1] // W
    Cout = packed["w3"].shape[1] // W
    assert Cin == Cout, "identity shortcut requires in_chans == out_chans"
    assert (W & (W - 1)) == 0, "lane roll-reduce assumes W is a power of two"
    NH = N * H

    x_p = x_nhwc.reshape(NH, W * Cin)                                # (NH, W*Cin)
    kernel = functools.partial(_residual_kernel, N=N, H=H, W=W, Cm=Cm, Cout=Cout)
    args = (x_p, packed["w1"], packed["w2"], packed["w3"],
            packed["g1"], packed["be1"], packed["g2"], packed["be2"],
            packed["g3"], packed["be3"])
    vmem = pl.BlockSpec(memory_space=pltpu.MemorySpace.VMEM)

    out_p = pl.pallas_call(
        kernel,
        out_shape=jax.ShapeDtypeStruct((NH, W * Cout), jnp.float32),
        in_specs=[vmem] * len(args),
        out_specs=vmem,
        compiler_params=pltpu.CompilerParams(vmem_limit_bytes=4 << 20),
    )(*args)
    return out_p.reshape(N, H, W, Cout)


# ------------------------ pure-JAX f32 reference ------------------------------
def reference(x_nhwc, w1, b1, g1, be1, w2, b2, g2, be2, w3, b3, g3, be3):
    def conv(x, w_hwio, b, pad):
        y = jax.lax.conv_general_dilated(
            x, w_hwio, window_strides=(1, 1), padding=[(pad, pad), (pad, pad)],
            dimension_numbers=('NHWC', 'HWIO', 'NHWC'),
            precision=jax.lax.Precision.HIGHEST)
        return y + b.reshape(1, 1, 1, -1)

    def bn(y, g, b):
        mean = jnp.mean(y, axis=(0, 1, 2), keepdims=True)
        var = jnp.mean((y - mean) ** 2, axis=(0, 1, 2), keepdims=True)
        return (y - mean) * jax.lax.rsqrt(var + EPS) * g.reshape(1, 1, 1, -1) \
            + b.reshape(1, 1, 1, -1)

    Cm = w1.shape[1]
    o = jnp.maximum(bn(conv(x_nhwc, w1.reshape(1, 1, -1, Cm), b1, 0), g1, be1), 0.0)
    o = jnp.maximum(bn(conv(o, w2, b2, 1), g2, be2), 0.0)
    o = bn(conv(o, w3.reshape(1, 1, Cm, -1), b3, 0), g3, be3)
    return jnp.maximum(o + x_nhwc, 0.0)


if __name__ == "__main__":
    # Small shapes consistent with the module: Residual(32, 32), x = (2,32,16,16) NCHW.
    N, Cin, H, W = 2, 32, 16, 16
    Cout = Cin
    Cm = Cout // 4

    key = jax.random.PRNGKey(0)
    k = jax.random.split(key, 13)

    x_nchw = jax.random.normal(k[0], (N, Cin, H, W), jnp.float32)

    # Deterministic parameter init in PyTorch layouts, then converted.
    w1_t = 0.1 * jax.random.normal(k[1], (Cm, Cin, 1, 1), jnp.float32)   # conv1.weight
    b1 = 0.1 * jax.random.normal(k[2], (Cm,), jnp.float32)               # conv1.bias
    w2_t = 0.1 * jax.random.normal(k[3], (Cm, Cm, 3, 3), jnp.float32)    # conv2.weight
    b2 = 0.1 * jax.random.normal(k[4], (Cm,), jnp.float32)               # conv2.bias
    w3_t = 0.1 * jax.random.normal(k[5], (Cout, Cm, 1, 1), jnp.float32)  # conv3.weight
    b3 = 0.1 * jax.random.normal(k[6], (Cout,), jnp.float32)             # conv3.bias
    g1 = 1.0 + 0.1 * jax.random.normal(k[7], (Cm,), jnp.float32)         # bn1.weight
    be1 = 0.1 * jax.random.normal(k[8], (Cm,), jnp.float32)              # bn1.bias
    g2 = 1.0 + 0.1 * jax.random.normal(k[9], (Cm,), jnp.float32)
    be2 = 0.1 * jax.random.normal(k[10], (Cm,), jnp.float32)
    g3 = 1.0 + 0.1 * jax.random.normal(k[11], (Cout,), jnp.float32)
    be3 = 0.1 * jax.random.normal(k[12], (Cout,), jnp.float32)

    # NCHW -> NHWC, OIHW -> matmul / HWIO layouts.
    x_nhwc = jnp.transpose(x_nchw, (0, 2, 3, 1))
    w1 = jnp.transpose(w1_t[:, :, 0, 0])            # (Cin, Cm)
    w2 = jnp.transpose(w2_t, (2, 3, 1, 0))          # (3, 3, Cm_in, Cm_out)  HWIO
    w3 = jnp.transpose(w3_t[:, :, 0, 0])            # (Cm, Cout)

    # One-time packing (hoisted out of the forward path), then the fused kernel.
    packed = jax.tree_util.tree_map(jax.block_until_ready,
                                    pack_residual_params(w1, w2, w3, g1, be1,
                                                         g2, be2, g3, be3, W))
    out_nhwc = residual_forward(x_nhwc, packed)
    out_nhwc = jax.block_until_ready(out_nhwc)
    out_nchw = jnp.transpose(out_nhwc, (0, 3, 1, 2))   # back to PyTorch NCHW

    # f32 reference WITH conv biases (demonstrates the bias cancellation is exact).
    ref = reference(x_nhwc, w1, b1, g1, be1, w2, b2, g2, be2, w3, b3, g3, be3)
    assert out_nchw.shape == (N, Cout, H, W)
    # Tolerance sized for bf16 MXU operands; BN / elementwise math stays f32.
    assert jnp.allclose(out_nhwc, ref, atol=1e-1, rtol=5e-2), \
        f"max err {jnp.max(jnp.abs(out_nhwc - ref))}"

    print("KERNEL_OK")
</pallas_src>

<mosaic_0001>
module attributes {stable_mosaic.version = 11 : i64} {
  func.func @_residual_kernel(%arg0: memref<32x512xf32, #tpu.memory_space<vmem>>, %arg1: memref<512x128xbf16, #tpu.memory_space<vmem>>, %arg2: memref<384x128xbf16, #tpu.memory_space<vmem>>, %arg3: memref<128x512xbf16, #tpu.memory_space<vmem>>, %arg4: memref<1x128xf32, #tpu.memory_space<vmem>>, %arg5: memref<1x128xf32, #tpu.memory_space<vmem>>, %arg6: memref<1x128xf32, #tpu.memory_space<vmem>>, %arg7: memref<1x128xf32, #tpu.memory_space<vmem>>, %arg8: memref<1x512xf32, #tpu.memory_space<vmem>>, %arg9: memref<1x512xf32, #tpu.memory_space<vmem>>, %arg10: memref<32x512xf32, #tpu.memory_space<vmem>>) attributes {dimension_semantics = [], scalar_prefetch = 0 : i64, scratch_operands = 0 : i64, tpu.core_type = #tpu.core_type<tc>} {
    %c0 = arith.constant 0 : index
    %c0_0 = arith.constant 0 : index
    %0 = vector.load %arg0[%c0, %c0_0] : memref<32x512xf32, #tpu.memory_space<vmem>>, vector<32x512xf32>
    %1 = arith.truncf %0 : vector<32x512xf32> to vector<32x512xbf16>
    %c0_1 = arith.constant 0 : index
    %c0_2 = arith.constant 0 : index
    %2 = vector.load %arg1[%c0_1, %c0_2] : memref<512x128xbf16, #tpu.memory_space<vmem>>, vector<512x128xbf16>
    %cst = arith.constant dense<0.000000e+00> : vector<32x128xf32>
    %3 = tpu.matmul %1, %2, %cst {dimension_numbers = #tpu.dot_dimension_numbers<[1], [0], [0], [1], [0, 0, 1, 1], [], []>} : vector<32x512xbf16>, vector<512x128xbf16>, vector<32x128xf32> -> vector<32x128xf32>
    %cst_3 = arith.constant dense<0.000000e+00> : vector<128xf32>
    %4 = vector.multi_reduction <add>, %3, %cst_3 [0] : vector<32x128xf32> to vector<128xf32>
    %5 = vector.shape_cast %4 : vector<128xf32> to vector<1x128xf32>
    %6 = arith.mulf %3, %3 : vector<32x128xf32>
    %cst_4 = arith.constant dense<0.000000e+00> : vector<128xf32>
    %7 = vector.multi_reduction <add>, %6, %cst_4 [0] : vector<32x128xf32> to vector<128xf32>
    %8 = vector.shape_cast %7 : vector<128xf32> to vector<1x128xf32>
    %9 = tpu.concatenate %5, %8 in 0 : vector<1x128xf32>, vector<1x128xf32> -> vector<2x128xf32>
    %c8_i32 = arith.constant 8 : i32
    %10 = tpu.dynamic_rotate %9 by %c8_i32 dim 1 : vector<2x128xf32>, i32 -> vector<2x128xf32>
    %11 = arith.addf %9, %10 : vector<2x128xf32>
    %c16_i32 = arith.constant 16 : i32
    %12 = tpu.dynamic_rotate %11 by %c16_i32 dim 1 : vector<2x128xf32>, i32 -> vector<2x128xf32>
    %13 = arith.addf %11, %12 : vector<2x128xf32>
    %c32_i32 = arith.constant 32 : i32
    %14 = tpu.dynamic_rotate %13 by %c32_i32 dim 1 : vector<2x128xf32>, i32 -> vector<2x128xf32>
    %15 = arith.addf %13, %14 : vector<2x128xf32>
    %c64_i32 = arith.constant 64 : i32
    %16 = tpu.dynamic_rotate %15 by %c64_i32 dim 1 : vector<2x128xf32>, i32 -> vector<2x128xf32>
    %17 = arith.addf %15, %16 : vector<2x128xf32>
    %18 = vector.extract_strided_slice %17 {offsets = [0, 0], sizes = [1, 128], strides = [1, 1]} : vector<2x128xf32> to vector<1x128xf32>
    %cst_5 = arith.constant 0.001953125 : f32
    %19 = vector.broadcast %cst_5 : f32 to vector<1x128xf32>
    %20 = arith.mulf %18, %19 : vector<1x128xf32>
    %21 = vector.extract_strided_slice %17 {offsets = [1, 0], sizes = [1, 128], strides = [1, 1]} : vector<2x128xf32> to vector<1x128xf32>
    %cst_6 = arith.constant 0.001953125 : f32
    %22 = vector.broadcast %cst_6 : f32 to vector<1x128xf32>
    %23 = arith.mulf %21, %22 : vector<1x128xf32>
    %24 = arith.mulf %20, %20 : vector<1x128xf32>
    %25 = arith.subf %23, %24 : vector<1x128xf32>
    %c0_7 = arith.constant 0 : index
    %c0_8 = arith.constant 0 : index
    %26 = vector.load %arg4[%c0_7, %c0_8] : memref<1x128xf32, #tpu.memory_space<vmem>>, vector<1x128xf32>
    %cst_9 = arith.constant 9.99999974E-6 : f32
    %27 = vector.broadcast %cst_9 : f32 to vector<1x128xf32>
    %28 = arith.addf %25, %27 : vector<1x128xf32>
    %29 = math.rsqrt %28 : vector<1x128xf32>
    %30 = arith.mulf %26, %29 : vector<1x128xf32>
    %c0_10 = arith.constant 0 : index
    %c0_11 = arith.constant 0 : index
    %31 = vector.load %arg5[%c0_10, %c0_11] : memref<1x128xf32, #tpu.memory_space<vmem>>, vector<1x128xf32>
    %32 = arith.mulf %20, %30 : vector<1x128xf32>
    %33 = arith.subf %31, %32 : vector<1x128xf32>
    %34 = vector.broadcast %30 : vector<1x128xf32> to vector<32x128xf32>
    %35 = arith.mulf %3, %34 : vector<32x128xf32>
    %36 = vector.broadcast %33 : vector<1x128xf32> to vector<32x128xf32>
    %37 = arith.addf %35, %36 : vector<32x128xf32>
    %cst_12 = arith.constant 0.000000e+00 : f32
    %38 = vector.broadcast %cst_12 : f32 to vector<32x128xf32>
    %39 = arith.maximumf %37, %38 : vector<32x128xf32>
    %40 = tpu.iota {dimensions = array<i32: 0>} : vector<32x1xi32>
    %c16_i32_13 = arith.constant 16 : i32
    %c0_i32 = arith.constant 0 : i32
    %41 = arith.cmpi eq, %c16_i32_13, %c0_i32 : i32
    %c1_i32 = arith.constant 1 : i32
    %42 = arith.select %41, %c1_i32, %c16_i32_13 : i32
    %43 = vector.broadcast %42 : i32 to vector<32x1xi32>
    %44 = arith.remsi %40, %43 : vector<32x1xi32>
    %c0_i32_14 = arith.constant 0 : i32
    %45 = vector.broadcast %c0_i32_14 : i32 to vector<32x1xi32>
    %46 = arith.cmpi ne, %44, %45 : vector<32x1xi32>
    %c0_i32_15 = arith.constant 0 : i32
    %47 = vector.broadcast %c0_i32_15 : i32 to vector<32x1xi32>
    %48 = arith.cmpi slt, %44, %47 : vector<32x1xi32>
    %c0_i32_16 = arith.constant 0 : i32
    %49 = arith.cmpi slt, %42, %c0_i32_16 : i32
    %50 = vector.broadcast %49 : i1 to vector<32x1xi1>
    %51 = vector.broadcast %50 : vector<32x1xi1> to vector<32x1xi1>
    %52 = arith.xori %48, %51 : vector<32x1xi1>
    %53 = arith.andi %52, %46 : vector<32x1xi1>
    %54 = vector.broadcast %42 : i32 to vector<32x1xi32>
    %55 = arith.addi %44, %54 : vector<32x1xi32>
    %56 = arith.select %53, %55, %44 : vector<32x1xi1>, vector<32x1xi32>
    %c1_i32_17 = arith.constant 1 : i32
    %57 = tpu.dynamic_rotate %39 by %c1_i32_17 dim 0 : vector<32x128xf32>, i32 -> vector<32x128xf32>
    %c31_i32 = arith.constant 31 : i32
    %58 = tpu.dynamic_rotate %39 by %c31_i32 dim 0 : vector<32x128xf32>, i32 -> vector<32x128xf32>
    %c0_i32_18 = arith.constant 0 : i32
    %59 = vector.broadcast %c0_i32_18 : i32 to vector<32x1xi32>
    %60 = arith.cmpi eq, %56, %59 : vector<32x1xi32>
    %cst_19 = arith.constant 0.000000e+00 : f32
    %61 = vector.shape_cast %60 : vector<32x1xi1> to vector<32x1xi1>
    %62 = vector.broadcast %61 : vector<32x1xi1> to vector<32x128xi1>
    %63 = vector.broadcast %cst_19 : f32 to vector<32x128xf32>
    %64 = arith.select %62, %63, %57 : vector<32x128xi1>, vector<32x128xf32>
    %c15_i32 = arith.constant 15 : i32
    %65 = vector.broadcast %c15_i32 : i32 to vector<32x1xi32>
    %66 = arith.cmpi eq, %56, %65 : vector<32x1xi32>
    %cst_20 = arith.constant 0.000000e+00 : f32
    %67 = vector.shape_cast %66 : vector<32x1xi1> to vector<32x1xi1>
    %68 = vector.broadcast %67 : vector<32x1xi1> to vector<32x128xi1>
    %69 = vector.broadcast %cst_20 : f32 to vector<32x128xf32>
    %70 = arith.select %68, %69, %58 : vector<32x128xi1>, vector<32x128xf32>
    %71 = arith.truncf %64 : vector<32x128xf32> to vector<32x128xbf16>
    %72 = arith.truncf %39 : vector<32x128xf32> to vector<32x128xbf16>
    %73 = arith.truncf %70 : vector<32x128xf32> to vector<32x128xbf16>
    %74 = tpu.concatenate %71, %72, %73 in 1 : vector<32x128xbf16>, vector<32x128xbf16>, vector<32x128xbf16> -> vector<32x384xbf16>
    %c0_21 = arith.constant 0 : index
    %c0_22 = arith.constant 0 : index
    %75 = vector.load %arg2[%c0_21, %c0_22] : memref<384x128xbf16, #tpu.memory_space<vmem>>, vector<384x128xbf16>
    %cst_23 = arith.constant dense<0.000000e+00> : vector<32x128xf32>
    %76 = tpu.matmul %74, %75, %cst_23 {dimension_numbers = #tpu.dot_dimension_numbers<[1], [0], [0], [1], [0, 0, 1, 1], [], []>} : vector<32x384xbf16>, vector<384x128xbf16>, vector<32x128xf32> -> vector<32x128xf32>
    %cst_24 = arith.constant dense<0.000000e+00> : vector<128xf32>
    %77 = vector.multi_reduction <add>, %76, %cst_24 [0] : vector<32x128xf32> to vector<128xf32>
    %78 = vector.shape_cast %77 : vector<128xf32> to vector<1x128xf32>
    %79 = arith.mulf %76, %76 : vector<32x128xf32>
    %cst_25 = arith.constant dense<0.000000e+00> : vector<128xf32>
    %80 = vector.multi_reduction <add>, %79, %cst_25 [0] : vector<32x128xf32> to vector<128xf32>
    %81 = vector.shape_cast %80 : vector<128xf32> to vector<1x128xf32>
    %82 = tpu.concatenate %78, %81 in 0 : vector<1x128xf32>, vector<1x128xf32> -> vector<2x128xf32>
    %c8_i32_26 = arith.constant 8 : i32
    %83 = tpu.dynamic_rotate %82 by %c8_i32_26 dim 1 : vector<2x128xf32>, i32 -> vector<2x128xf32>
    %84 = arith.addf %82, %83 : vector<2x128xf32>
    %c16_i32_27 = arith.constant 16 : i32
    %85 = tpu.dynamic_rotate %84 by %c16_i32_27 dim 1 : vector<2x128xf32>, i32 -> vector<2x128xf32>
    %86 = arith.addf %84, %85 : vector<2x128xf32>
    %c32_i32_28 = arith.constant 32 : i32
    %87 = tpu.dynamic_rotate %86 by %c32_i32_28 dim 1 : vector<2x128xf32>, i32 -> vector<2x128xf32>
    %88 = arith.addf %86, %87 : vector<2x128xf32>
    %c64_i32_29 = arith.constant 64 : i32
    %89 = tpu.dynamic_rotate %88 by %c64_i32_29 dim 1 : vector<2x128xf32>, i32 -> vector<2x128xf32>
    %90 = arith.addf %88, %89 : vector<2x128xf32>
    %91 = vector.extract_strided_slice %90 {offsets = [0, 0], sizes = [1, 128], strides = [1, 1]} : vector<2x128xf32> to vector<1x128xf32>
    %cst_30 = arith.constant 0.001953125 : f32
    %92 = vector.broadcast %cst_30 : f32 to vector<1x128xf32>
    %93 = arith.mulf %91, %92 : vector<1x128xf32>
    %94 = vector.extract_strided_slice %90 {offsets = [1, 0], sizes = [1, 128], strides = [1, 1]} : vector<2x128xf32> to vector<1x128xf32>
    %cst_31 = arith.constant 0.001953125 : f32
    %95 = vector.broadcast %cst_31 : f32 to vector<1x128xf32>
    %96 = arith.mulf %94, %95 : vector<1x128xf32>
    %97 = arith.mulf %93, %93 : vector<1x128xf32>
    %98 = arith.subf %96, %97 : vector<1x128xf32>
    %c0_32 = arith.constant 0 : index
    %c0_33 = arith.constant 0 : index
    %99 = vector.load %arg6[%c0_32, %c0_33] : memref<1x128xf32, #tpu.memory_space<vmem>>, vector<1x128xf32>
    %cst_34 = arith.constant 9.99999974E-6 : f32
    %100 = vector.broadcast %cst_34 : f32 to vector<1x128xf32>
    %101 = arith.addf %98, %100 : vector<1x128xf32>
    %102 = math.rsqrt %101 : vector<1x128xf32>
    %103 = arith.mulf %99, %102 : vector<1x128xf32>
    %c0_35 = arith.constant 0 : index
    %c0_36 = arith.constant 0 : index
    %104 = vector.load %arg7[%c0_35, %c0_36] : memref<1x128xf32, #tpu.memory_space<vmem>>, vector<1x128xf32>
    %105 = arith.mulf %93, %103 : vector<1x128xf32>
    %106 = arith.subf %104, %105 : vector<1x128xf32>
    %107 = vector.broadcast %103 : vector<1x128xf32> to vector<32x128xf32>
    %108 = arith.mulf %76, %107 : vector<32x128xf32>
    %109 = vector.broadcast %106 : vector<1x128xf32> to vector<32x128xf32>
    %110 = arith.addf %108, %109 : vector<32x128xf32>
    %cst_37 = arith.constant 0.000000e+00 : f32
    %111 = vector.broadcast %cst_37 : f32 to vector<32x128xf32>
    %112 = arith.maximumf %110, %111 : vector<32x128xf32>
    %113 = arith.truncf %112 : vector<32x128xf32> to vector<32x128xbf16>
    %c0_38 = arith.constant 0 : index
    %c0_39 = arith.constant 0 : index
    %114 = vector.load %arg3[%c0_38, %c0_39] : memref<128x512xbf16, #tpu.memory_space<vmem>>, vector<128x512xbf16>
    %cst_40 = arith.constant dense<0.000000e+00> : vector<32x512xf32>
    %115 = tpu.matmul %113, %114, %cst_40 {dimension_numbers = #tpu.dot_dimension_numbers<[1], [0], [0], [1], [0, 0, 1, 1], [], []>} : vector<32x128xbf16>, vector<128x512xbf16>, vector<32x512xf32> -> vector<32x512xf32>
    %cst_41 = arith.constant dense<0.000000e+00> : vector<512xf32>
    %116 = vector.multi_reduction <add>, %115, %cst_41 [0] : vector<32x512xf32> to vector<512xf32>
    %117 = vector.shape_cast %116 : vector<512xf32> to vector<1x512xf32>
    %118 = arith.mulf %115, %115 : vector<32x512xf32>
    %cst_42 = arith.constant dense<0.000000e+00> : vector<512xf32>
    %119 = vector.multi_reduction <add>, %118, %cst_42 [0] : vector<32x512xf32> to vector<512xf32>
    %120 = vector.shape_cast %119 : vector<512xf32> to vector<1x512xf32>
    %121 = tpu.concatenate %117, %120 in 0 : vector<1x512xf32>, vector<1x512xf32> -> vector<2x512xf32>
    %c32_i32_43 = arith.constant 32 : i32
    %122 = tpu.dynamic_rotate %121 by %c32_i32_43 dim 1 : vector<2x512xf32>, i32 -> vector<2x512xf32>
    %123 = arith.addf %121, %122 : vector<2x512xf32>
    %c64_i32_44 = arith.constant 64 : i32
    %124 = tpu.dynamic_rotate %123 by %c64_i32_44 dim 1 : vector<2x512xf32>, i32 -> vector<2x512xf32>
    %125 = arith.addf %123, %124 : vector<2x512xf32>
    %c128_i32 = arith.constant 128 : i32
    %126 = tpu.dynamic_rotate %125 by %c128_i32 dim 1 : vector<2x512xf32>, i32 -> vector<2x512xf32>
    %127 = arith.addf %125, %126 : vector<2x512xf32>
    %c256_i32 = arith.constant 256 : i32
    %128 = tpu.dynamic_rotate %127 by %c256_i32 dim 1 : vector<2x512xf32>, i32 -> vector<2x512xf32>
    %129 = arith.addf %127, %128 : vector<2x512xf32>
    %130 = vector.extract_strided_slice %129 {offsets = [0, 0], sizes = [1, 512], strides = [1, 1]} : vector<2x512xf32> to vector<1x512xf32>
    %cst_45 = arith.constant 0.001953125 : f32
    %131 = vector.broadcast %cst_45 : f32 to vector<1x512xf32>
    %132 = arith.mulf %130, %131 : vector<1x512xf32>
    %133 = vector.extract_strided_slice %129 {offsets = [1, 0], sizes = [1, 512], strides = [1, 1]} : vector<2x512xf32> to vector<1x512xf32>
    %cst_46 = arith.constant 0.001953125 : f32
    %134 = vector.broadcast %cst_46 : f32 to vector<1x512xf32>
    %135 = arith.mulf %133, %134 : vector<1x512xf32>
    %136 = arith.mulf %132, %132 : vector<1x512xf32>
    %137 = arith.subf %135, %136 : vector<1x512xf32>
    %c0_47 = arith.constant 0 : index
    %c0_48 = arith.constant 0 : index
    %138 = vector.load %arg8[%c0_47, %c0_48] : memref<1x512xf32, #tpu.memory_space<vmem>>, vector<1x512xf32>
    %cst_49 = arith.constant 9.99999974E-6 : f32
    %139 = vector.broadcast %cst_49 : f32 to vector<1x512xf32>
    %140 = arith.addf %137, %139 : vector<1x512xf32>
    %141 = math.rsqrt %140 : vector<1x512xf32>
    %142 = arith.mulf %138, %141 : vector<1x512xf32>
    %c0_50 = arith.constant 0 : index
    %c0_51 = arith.constant 0 : index
    %143 = vector.load %arg9[%c0_50, %c0_51] : memref<1x512xf32, #tpu.memory_space<vmem>>, vector<1x512xf32>
    %144 = arith.mulf %132, %142 : vector<1x512xf32>
    %145 = arith.subf %143, %144 : vector<1x512xf32>
    %146 = vector.broadcast %142 : vector<1x512xf32> to vector<32x512xf32>
    %147 = arith.mulf %115, %146 : vector<32x512xf32>
    %148 = vector.broadcast %145 : vector<1x512xf32> to vector<32x512xf32>
    %149 = arith.addf %147, %148 : vector<32x512xf32>
    %150 = arith.addf %149, %0 : vector<32x512xf32>
    %cst_52 = arith.constant 0.000000e+00 : f32
    %151 = vector.broadcast %cst_52 : f32 to vector<32x512xf32>
    %152 = arith.maximumf %150, %151 : vector<32x512xf32>
    %c0_53 = arith.constant 0 : index
    %c0_54 = arith.constant 0 : index
    %153 = vector.load %arg10[%c0_53, %c0_54] : memref<32x512xf32, #tpu.memory_space<vmem>>, vector<32x512xf32>
    tpu.vector_store %arg10[%c0_53, %c0_54], %152 {strides = array<i32>} : memref<32x512xf32, #tpu.memory_space<vmem>>, vector<32x512xf32>,
    return
  }
}

</mosaic_0001>

<bundles_post_ra>
// kernel: residual_forward.1
= control target key start
LH: loop header
LB: loop body
LE: loop exit
PB: predicated region body
PF: predicated region fallthrough
CT: control target
= control target key end

     0   :  { %15 = vsyncpa [#allocation3], 0  ;;  %s2022_s13 = smov [#allocation2]   ;;  %s2696_s0 = inlined_call_operand.vmem [shape: f32[32,512], index: 0, kind: input, shape index: {}]   ;;  %s2697_s1 = inlined_call_operand.vmem [shape: bf16[512,128], index: 1, kind: input, shape index: {}]   ;;  %s2698_s2 = inlined_call_operand.hbm [shape: bf16[384,128], index: 2, kind: input, shape index: {}]   ;;  %s2699_s3 = inlined_call_operand.vmem [shape: bf16[128,512], index: 3, kind: input, shape index: {}]   ;;  %s2700_s4 = inlined_call_operand.vmem [shape: f32[1,128], index: 4, kind: input, shape index: {}]   ;;  %s2701_s5 = inlined_call_operand.vmem [shape: f32[1,128], index: 5, kind: input, shape index: {}]   ;;  %s2702_s6 = inlined_call_operand.vmem [shape: f32[1,128], index: 6, kind: input, shape index: {}]   ;;  %s2703_s7 = inlined_call_operand.vmem [shape: f32[1,128], index: 7, kind: input, shape index: {}]   ;;  %s2704_s8 = inlined_call_operand.vmem [shape: f32[1,512], index: 8, kind: input, shape index: {}]   ;;  %s2705_s9 = inlined_call_operand.vmem [shape: f32[1,512], index: 9, kind: input, shape index: {}]   ;;  %s2706_s10 = inlined_call_operand.vmem [shape: f32[32,512], index: 10, kind: output, shape index: {}]  }
   0x1   :  { %s25_s14 = sshll.u32 %s2022_s13, 4  ;;  %s1998_s17 = scalar_lea.hbm %s2698_s2, 3072  ;;  %s26_s14 = int_to_ptr.vmem [resolvable:$true] %s25_s14 }
   0x2   :  { %p1999_p0 = scmp.ne.s32.totalorder %s2698_s2, %s1998_s17  ;;  %p2002_p1 = scmp.lt.u32.totalorder %s1998_s17, %s2698_s2 }
   0x4   :  { %p2004_p2 = pnand %p2002_p1, %p1999_p0 }
   0x6   :  { %2007 = shalt.err (!%p2004_p2)
}
   0x7   :  { %s2008_s22 = scalar_lea.vmem %s26_s14, 3072  ;;  %p2013_p4 = scmp.lt.s32.totalorder %s26_s14, %s26_s14 }
   0x8   :  { %p2009_p3 = scmp.ne.s32.totalorder %s26_s14, %s2008_s22  ;;  %p2014_p5 = scmp.lt.s32.totalorder %s2008_s22, %s2008_s22 }
   0xa   :  { %p2015_p6 = por %p2014_p5, %p2013_p4 }
   0xc   :  { %p2016_p7 = pnand %p2015_p6, %p2009_p3 }
   0xe   :  { %2019 = shalt.err (!%p2016_p7)
}
   0xf   :  { %s2023_s23 = smov 64   ;;  %s2024_s24 = smov 4  }
  0x10   :  { %31 = dma.hbm_to_vmem [thread:$0]  %s2698_s2, 3072, %s26_s14, [#allocation3], %s2023_s23, %s2023_s23, %s2024_s24  }
  0x11   :  { %2020 = dma.done.wait [#allocation3], 3072  }
  0x12   :  { %2021 = vsyncadd [#allocation3], 4294964224  ;;  %v1870_v0 = vld [vmem:[%s2697_s1 + $0x40] sm:$0xff]   ;;  %v1874_v4 = vld [vmem:[%s2697_s1 + $0x48] sm:$0xff]   ;;  %vm450_vm0 = vcmask 1040384   ;;  %s2025_s20 = smov 8  }
  0x13   :  { %v1871_v1 = vld [vmem:[%s2697_s1 + $0xc0] sm:$0xff]   ;;  %1747 = vmatprep.subr.bf16.mxu0 %v1870_v0  ;;  %v1875_v5 = vld [vmem:[%s2697_s1 + $0xc8] sm:$0xff]   ;;  %v1878_v8 = vld [vmem:[%s2697_s1 + $0x50] sm:$0xff]   ;;  %s2026_s21 = smov 16   ;;  %s2027_s22 = smov 32   ;;  %vm2029_vm6 = vmmov 1  }
  0x14   :  { %v1872_v2 = vld [vmem:[%s2697_s1] sm:$0xff]   ;;  %1775 = vmatprep.subr.bf16.mxu1 %v1871_v1  ;;  %v1876_v6 = vld [vmem:[%s2697_s1 + $0x8] sm:$0xff]   ;;  %v1879_v9 = vld [vmem:[%s2697_s1 + $0xd0] sm:$0xff]  }
  0x15   :  { %v1873_v3 = vld [vmem:[%s2697_s1 + $0x80] sm:$0xff]   ;;  %1748 = vmatpush3.bf16.msra.mxu0 %v1872_v2  ;;  %v1877_v7 = vld [vmem:[%s2697_s1 + $0x88] sm:$0xff]   ;;  %v1880_v10 = vld [vmem:[%s2697_s1 + $0x10] sm:$0xff]  }
  0x16   :  { %1776 = vmatpush3.bf16.msra.mxu1 %v1873_v3  ;;  %1749 = vmatprep.subr.bf16.mxu0 %v1874_v4  ;;  %v1881_v11 = vld [vmem:[%s2697_s1 + $0x90] sm:$0xff]   ;;  %v1882_v12 = vld [vmem:[%s2697_s1 + $0x58] sm:$0xff]   ;;  %v1886_v16 = vld [vmem:[%s2697_s1 + $0x60] sm:$0xff]  }
  0x17   :  { %1777 = vmatprep.subr.bf16.mxu1 %v1875_v5  ;;  %v1883_v13 = vld [vmem:[%s2697_s1 + $0xd8] sm:$0xff]   ;;  %v1887_v17 = vld [vmem:[%s2697_s1 + $0xe0] sm:$0xff]   ;;  %v1890_v20 = vld [vmem:[%s2697_s1 + $0x68] sm:$0xff]  }
  0x18   :  { %v1884_v14 = vld [vmem:[%s2697_s1 + $0x18] sm:$0xff]   ;;  %v1888_v18 = vld [vmem:[%s2697_s1 + $0x20] sm:$0xff]   ;;  %v1891_v21 = vld [vmem:[%s2697_s1 + $0xe8] sm:$0xff]  }
  0x19   :  { %1750 = vmatpush3.bf16.msra.mxu0 %v1876_v6  ;;  %v1885_v15 = vld [vmem:[%s2697_s1 + $0x98] sm:$0xff]   ;;  %v1889_v19 = vld [vmem:[%s2697_s1 + $0xa0] sm:$0xff]   ;;  %v1892_v22 = vld [vmem:[%s2697_s1 + $0x28] sm:$0xff]  }
  0x1a   :  { %1778 = vmatpush3.bf16.msra.mxu1 %v1877_v7  ;;  %1751 = vmatprep.subr.bf16.mxu0 %v1878_v8  ;;  %v1893_v23 = vld [vmem:[%s2697_s1 + $0xa8] sm:$0xff]   ;;  %v1894_v24 = vld [vmem:[%s2697_s1 + $0x70] sm:$0xff]   ;;  %v1898_v28 = vld [vmem:[%s2697_s1 + $0x78] sm:$0xff]  }
  0x1b   :  { %1779 = vmatprep.subr.bf16.mxu1 %v1879_v9  ;;  %v1895_v25 = vld [vmem:[%s2697_s1 + $0xf0] sm:$0xff]   ;;  %v1899_v29 = vld [vmem:[%s2697_s1 + $0xf8] sm:$0xff]   ;;  %v51_v32 = vld [vmem:[%s2696_s0 + $0x8] sm:$0xff] }
  0x1c   :  { %v1896_v26 = vld [vmem:[%s2697_s1 + $0x30] sm:$0xff]   ;;  %v1900_v30 = vld [vmem:[%s2697_s1 + $0x38] sm:$0xff]   ;;  %v55_v33 = vld [vmem:[%s2696_s0 + $0x28] sm:$0xff] }
  0x1d   :  { %1752 = vmatpush3.bf16.msra.mxu0 %v1880_v10  ;;  %v1897_v27 = vld [vmem:[%s2697_s1 + $0xb0] sm:$0xff]   ;;  %v1901_v31 = vld [vmem:[%s2697_s1 + $0xb8] sm:$0xff]   ;;  %v67_v35 = vpack.c.bf16 %v55_v33, %v51_v32  ;;  %v50_v37 = vld [vmem:[%s2696_s0] sm:$0xff] }
  0x1e   :  { %1780 = vmatpush3.bf16.msra.mxu1 %v1881_v11  ;;  %1753 = vmatprep.subr.bf16.mxu0 %v1882_v12  ;;  %v53_v34 = vld [vmem:[%s2696_s0 + $0x18] sm:$0xff]  ;;  %v54_v38 = vld [vmem:[%s2696_s0 + $0x20] sm:$0xff]  ;;  %v52_v41 = vld [vmem:[%s2696_s0 + $0x10] sm:$0xff] }
  0x1f   :  { %1781 = vmatprep.subr.bf16.mxu1 %v1883_v13  ;;  %v57_v36 = vld [vmem:[%s2696_s0 + $0x38] sm:$0xff]  ;;  %v66_v40 = vpack.c.bf16 %v54_v38, %v50_v37  ;;  %v56_v42 = vld [vmem:[%s2696_s0 + $0x30] sm:$0xff]  ;;  %v59_v43 = vld [vmem:[%s2696_s0 + $0x48] sm:$0xff]  ;;  %362 = vmatprep.mubr.bf16.mxu0 %v67_v35 }
  0x20   :  { %v69_v39 = vpack.c.bf16 %v57_v36, %v53_v34  ;;  %v68_v44 = vpack.c.bf16 %v56_v42, %v52_v41  ;;  %v63_v45 = vld [vmem:[%s2696_s0 + $0x68] sm:$0xff]  ;;  %v61_v46 = vld [vmem:[%s2696_s0 + $0x58] sm:$0xff]  ;;  %v58_v50 = vld [vmem:[%s2696_s0 + $0x40] sm:$0xff] }
  0x21   :  { %1754 = vmatpush3.bf16.msra.mxu0 %v1884_v14  ;;  %v65_v47 = vld [vmem:[%s2696_s0 + $0x78] sm:$0xff]  ;;  %v71_v48 = vpack.c.bf16 %v63_v45, %v59_v43  ;;  %v62_v51 = vld [vmem:[%s2696_s0 + $0x60] sm:$0xff]  ;;  %v60_v52 = vld [vmem:[%s2696_s0 + $0x50] sm:$0xff] }
  0x22   :  { %1782 = vmatpush3.bf16.msra.mxu1 %v1885_v15  ;;  %1755 = vmatprep.subr.bf16.mxu0 %v1886_v16  ;;  %v73_v49 = vpack.c.bf16 %v65_v47, %v61_v46  ;;  %v64_v53 = vld [vmem:[%s2696_s0 + $0x70] sm:$0xff]  ;;  %v70_v54 = vpack.c.bf16 %v62_v51, %v58_v50  ;;  %v1903_v50 = vld [vmem:[#allocation2] sm:$0xff]  }
  0x23   :  { %1783 = vmatprep.subr.bf16.mxu1 %v1887_v17  ;;  %411 = vmatprep.mubr.bf16.mxu1 %v69_v39  ;;  %v72_v55 = vpack.c.bf16 %v64_v53, %v60_v52  ;;  %v1904_v51 = vld [vmem:[#allocation2 + $0x80] sm:$0xff]   ;;  %v1905_v52 = vld [vmem:[#allocation2 + $0x48] sm:$0xff]  }
  0x24   :  { %v1906_v53 = vld [vmem:[#allocation2 + $0x8] sm:$0xff]  }
  0x25   :  { %1756 = vmatpush3.bf16.msra.mxu0 %v1888_v18 }
  0x26   :  { %1784 = vmatpush3.bf16.msra.mxu1 %v1889_v19  ;;  %1757 = vmatprep.subr.bf16.mxu0 %v1890_v20 }
  0x27   :  { %1785 = vmatprep.subr.bf16.mxu1 %v1891_v21 }
  0x29   :  { %1758 = vmatpush3.bf16.msra.mxu0 %v1892_v22 }
  0x2a   :  { %1786 = vmatpush3.bf16.msra.mxu1 %v1893_v23  ;;  %1759 = vmatprep.subr.bf16.mxu0 %v1894_v24 }
  0x2b   :  { %1787 = vmatprep.subr.bf16.mxu1 %v1895_v25 }
  0x2d   :  { %1760 = vmatpush3.bf16.msra.mxu0 %v1896_v26 }
  0x2e   :  { %1788 = vmatpush3.bf16.msra.mxu1 %v1897_v27  ;;  %1761 = vmatprep.subr.bf16.mxu0 %v1898_v28 }
  0x2f   :  { %1789 = vmatprep.subr.bf16.mxu1 %v1899_v29 }
  0x31   :  { %1762 = vmatpush3.bf16.msra.mxu0 %v1900_v30 }
  0x32   :  { %1790 = vmatpush3.bf16.msra.mxu1 %v1901_v31 }
  0x33   :  { %1841 = vmatprep.subr.bf16.mxu1 %v1904_v51 }
  0x34   :  { %363 = vmatmul.mubr.bf16.vlgmr.msra.gmra.mrb[0].mxu0 %v66_v40 }
  0x35   :  { %412 = vmatmul.mubr.bf16.vlgmr.msra.gmra.mrb[0].mxu1 %v68_v44  ;;  %370 = vmatprep.mubr.bf16.mxu0 %v71_v48 }
  0x36   :  { %419 = vmatprep.mubr.bf16.mxu1 %v73_v49  ;;  %v1902_v49 = vld [vmem:[#allocation2 + $0x40] sm:$0xff]   ;;  %1842 = vmatpush3.bf16.msra.mxu1 %v1904_v51 }
  0x37   :  { %1803 = vmatprep.subr.bf16.mxu0 %v1902_v49 }
  0x38   :  { %1804 = vmatpush3.bf16.msra.mxu0 %v1903_v50 }
  0x39   :  { %1805 = vmatprep.subr.bf16.mxu0 %v1905_v52 }
  0x3c   :  { %371 = vmatmul.mubr.bf16.gmra.mrb[4].mxu0 %v70_v54  ;;  %v1907_v54 = vld [vmem:[#allocation2 + $0x88] sm:$0xff]  }
  0x3d   :  { %420 = vmatmul.mubr.bf16.gmra.mrb[4].mxu1 %v72_v55  ;;  %1806 = vmatpush3.bf16.msra.mxu0 %v1906_v53  ;;  %v1908_v55 = vld [vmem:[#allocation2 + $0x50] sm:$0xff]  }
  0x3e   :  { %1843 = vmatprep.subr.bf16.mxu1 %v1907_v54  ;;  %1807 = vmatprep.subr.bf16.mxu0 %v1908_v55 }
  0x3f   :  { %1844 = vmatpush3.bf16.msra.mxu1 %v1907_v54 }
 0x107   :  { %v1763_v56 = vpop.f32.mrb[0].mxu0 }
 0x108   :  { %v1791_v57 = vpop.f32.mrb[0].mxu1  ;;  %v1764_v58 = vpop.f32.mrb[1].mxu0 }
 0x109   :  { %v1765_v59 = vadd.f32 %v1764_v58, %v1763_v56  ;;  %v1792_v60 = vpop.f32.mrb[1].mxu1  ;;  %v1766_v61 = vpop.f32.mrb[2].mxu0  ;;  %v1909_v56 = vld [vmem:[#allocation2 + $0x10] sm:$0xff]   ;;  %v1911_v58 = vld [vmem:[#allocation2 + $0x58] sm:$0xff]  }
 0x10a   :  { %v1793_v62 = vadd.f32 %v1792_v60, %v1791_v57  ;;  %v1794_v63 = vpop.f32.mrb[2].mxu1  ;;  %v1767_v0 = vpop.f32.mrb[3].mxu0  ;;  %v1910_v57 = vld [vmem:[#allocation2 + $0x90] sm:$0xff]   ;;  %1808 = vmatpush3.bf16.msra.mxu0 %v1909_v56  ;;  %v1913_v60 = vld [vmem:[#allocation2 + $0x98] sm:$0xff]  }
 0x10b   :  { %v1768_v1 = vadd.f32 %v1767_v0, %v1766_v61  ;;  %v1795_v2 = vpop.f32.mrb[3].mxu1  ;;  %1845 = vmatprep.subr.bf16.mxu1 %v1910_v57  ;;  %1809 = vmatprep.subr.bf16.mxu0 %v1911_v58  ;;  %v1914_v61 = vld [vmem:[#allocation2 + $0x60] sm:$0xff]   ;;  %v1917_v0 = vld [vmem:[#allocation2 + $0x68] sm:$0xff]  }
 0x10c   :  { %v2244_v3 = vadd.f32 %v1793_v62, %v1765_v59  ;;  %v1796_v4 = vadd.f32 %v1795_v2, %v1794_v63  ;;  %1846 = vmatpush3.bf16.msra.mxu1 %v1910_v57  ;;  %v1912_v59 = vld [vmem:[#allocation2 + $0x18] sm:$0xff]   ;;  %v1915_v62 = vld [vmem:[#allocation2 + $0x20] sm:$0xff]   ;;  %v1919_v2 = vld [vmem:[#allocation2 + $0xa8] sm:$0xff]  }
 0x10d   :  { %1847 = vmatprep.subr.bf16.mxu1 %v1913_v60  ;;  %v1916_v63 = vld [vmem:[#allocation2 + $0xa0] sm:$0xff]  }
 0x10e   :  { %v2246_v5 = vadd.f32 %v1796_v4, %v1768_v1  ;;  %v437_v18 = vmul.f32 %v2244_v3, %v2244_v3  ;;  %1810 = vmatpush3.bf16.msra.mxu0 %v1912_v59  ;;  %v1918_v1 = vld [vmem:[#allocation2 + $0x28] sm:$0xff]   ;;  %v1920_v4 = vld [vmem:[#allocation2 + $0x70] sm:$0xff]  }
 0x10f   :  { %v1769_v6 = vpop.f32.mrb[4].mxu0  ;;  %1811 = vmatprep.subr.bf16.mxu0 %v1914_v61 }
 0x110   :  { %v1797_v7 = vpop.f32.mrb[4].mxu1  ;;  %v1770_v8 = vpop.f32.mrb[5].mxu0  ;;  %v438_v12 = vmul.f32 %v2246_v5, %v2246_v5  ;;  %v428_v19 = vadd.f32 %v2246_v5, %v2244_v3  ;;  %1848 = vmatpush3.bf16.msra.mxu1 %v1913_v60 }
 0x111   :  { %v1771_v9 = vadd.f32 %v1770_v8, %v1769_v6  ;;  %v1798_v10 = vpop.f32.mrb[5].mxu1  ;;  %v1772_v11 = vpop.f32.mrb[6].mxu0  ;;  %1849 = vmatprep.subr.bf16.mxu1 %v1916_v63  ;;  %v1921_v6 = vld [vmem:[#allocation2 + $0x30] sm:$0xff]   ;;  %v1923_v8 = vld [vmem:[#allocation2 + $0x78] sm:$0xff]  }
 0x112   :  { %v1799_v13 = vadd.f32 %v1798_v10, %v1797_v7  ;;  %v1800_v14 = vpop.f32.mrb[6].mxu1  ;;  %v1773_v15 = vpop.f32.mrb[7].mxu0  ;;  %v441_v22 = vadd.f32 %v438_v12, %v437_v18  ;;  %1812 = vmatpush3.bf16.msra.mxu0 %v1915_v62  ;;  %v1922_v7 = vld [vmem:[#allocation2 + $0xb0] sm:$0xff]   ;;  %v1925_v10 = vld [vmem:[#allocation2 + $0xb8] sm:$0xff]   ;;  %v2028_v18 = vmov 1966171168  }
 0x113   :  { %v1774_v16 = vadd.f32 %v1773_v15, %v1772_v11  ;;  %v1801_v17 = vpop.f32.mrb[7].mxu1  ;;  %1813 = vmatprep.subr.bf16.mxu0 %v1917_v0 }
 0x114   :  { %v2254_v20 = vadd.f32 %v1799_v13, %v1771_v9  ;;  %v1802_v21 = vadd.f32 %v1801_v17, %v1800_v14  ;;  %1850 = vmatpush3.bf16.msra.mxu1 %v1916_v63  ;;  %v1924_v9 = vld [vmem:[#allocation2 + $0x38] sm:$0xff]  }
 0x115   :  { %1851 = vmatprep.subr.bf16.mxu1 %v1919_v2 }
 0x116   :  { %v429_v23 = vadd.f32 %v428_v19, %v2254_v20  ;;  %v439_v24 = vmul.f32 %v2254_v20, %v2254_v20  ;;  %v2259_v25 = vadd.f32 %v1802_v21, %v1774_v16  ;;  %1814 = vmatpush3.bf16.msra.mxu0 %v1918_v1  ;;  %v475_v19 = vunpack.c.l.s4 %v2028_v18 }
 0x117   :  { %1815 = vmatprep.subr.bf16.mxu0 %v1920_v4  ;;  %v477_v21 = vlaneseq }
 0x118   :  { %v442_v26 = vadd.f32 %v441_v22, %v439_v24  ;;  %v430_v27 = vadd.f32 %v429_v23, %v2259_v25  ;;  %v440_v28 = vmul.f32 %v2259_v25, %v2259_v25  ;;  %1852 = vmatpush3.bf16.msra.mxu1 %v1919_v2  ;;  %v476_v22 = vunpack.c.0.s8 %v475_v19 }
 0x119   :  { %1853 = vmatprep.subr.bf16.mxu1 %v1922_v7  ;;  %v2270_v23 = vshrl.u32 %v477_v21, 7 }
 0x11a   :  { %v431_v29 = vrot.slane %v430_v27, 4  ;;  %v443_v30 = vadd.f32 %v442_v26, %v440_v28  ;;  %1816 = vmatpush3.bf16.msra.mxu0 %v1921_v6 }
 0x11b   :  { %1817 = vmatprep.subr.bf16.mxu0 %v1923_v8  ;;  %v2273_v24 = vsub.s32 %v476_v22, %v2270_v23  ;;  %vm575_vm1 = vcmp.lt.s32.totalorder %v2270_v23, 1  ;;  %vm584_vm3 = vcmp.lt.s32.totalorder %v2270_v23, 7 }
 0x11c   :  { %v432_v31 = vadd.f32 %v431_v29, %v430_v27  ;;  %v444_v32 = vrot.slane %v443_v30, 4  ;;  %1854 = vmatpush3.bf16.msra.mxu1 %v1922_v7  ;;  %v470_v29 = vld [vmem:[%s2700_s4] sm:$0x1] }
 0x11d   :  { %1855 = vmatprep.subr.bf16.mxu1 %v1925_v10 }
 0x11e   :  { %v433_v33 = vrot.slane %v432_v31, 2  ;;  %v445_v34 = vadd.f32 %v444_v32, %v443_v30  ;;  %1818 = vmatpush3.bf16.msra.mxu0 %v1924_v9  ;;  %v2280_v30 = vsub.s32 0, %v2270_v23 }
 0x120   :  { %v434_v35 = vadd.f32 %v433_v33, %v432_v31  ;;  %v446_v36 = vrot.slane %v445_v34, 2  ;;  %1856 = vmatpush3.bf16.msra.mxu1 %v1925_v10  ;;  %v491_v33 = vld [vmem:[%s2701_s5] sm:$0x1] }
 0x122   :  { %v435_v37 = vrot.slane %v434_v35, 1  ;;  %v447_v38 = vadd.f32 %v446_v36, %v445_v34  ;;  %v520_v36 = vadd.s32 8, %v2270_v23 }
 0x124   :  { %v448_v39 = vrot.slane %v447_v38, 1  ;;  %v436_v40 = vadd.f32 %v435_v37, %v434_v35  ;;  %v522_v37 = vadd.s32 24, %v2270_v23 }
 0x126   :  { %v449_v41 = vadd.f32 %v448_v39, %v447_v38 }
 0x128   :  { %v451_v42 = vsel %vm450_vm0, %v436_v40, %v449_v41 }
 0x129   :  { %452 = vrot.lane.b32.xlu0 %v451_v42, %s2025_s20 }
 0x19b   :  { %v453_v43 = vpop.permute.xlu0 %452 }
 0x19c   :  { %v454_v44 = vadd.f32 %v453_v43, %v451_v42 }
 0x19e   :  { %455 = vrot.lane.b32.xlu0 %v454_v44, %s2026_s21 }
 0x210   :  { %v456_v45 = vpop.permute.xlu0 %455 }
 0x211   :  { %v457_v46 = vadd.f32 %v456_v45, %v454_v44  ;;  %v527_v44 = vand.u32 15, %v2270_v23  ;;  %v534_v45 = vand.u32 15, %v520_v36 }
 0x213   :  { %458 = vrot.lane.b32.xlu1 %v457_v46, %s2027_s22  ;;  %vm2297_vm2 = vcmp.ne.s32.totalorder %v527_v44, 0  ;;  %vm2302_vm4 = vcmp.ne.s32.totalorder %v534_v45, 15 }
 0x214   :  { %vm1696_vm7 = vmpackc.low %vm2029_vm6, %vm2297_vm2 }
 0x215   :  { %vm1704_vm8 = vmpackc.low %vm2302_vm4, %vm2029_vm6 }
 0x285   :  { %v459_v47 = vpop.permute.xlu1 %458 }
 0x286   :  { %v460_v48 = vadd.f32 %v459_v47, %v457_v46  ;;  %v548_v46 = vand.u32 15, %v522_v37 }
 0x288   :  { %461 = vrot.lane.b32.xlu1 %v460_v48, %s2023_s23  ;;  %vm2306_vm5 = vcmp.ne.s32.totalorder %v548_v46, 15 }
 0x289   :  { %vm1708_vm9 = vmpackc.low %vm2306_vm5, %vm2029_vm6 }
 0x2fa   :  { %v462_v11 = vpop.permute.xlu1 %461 }
 0x2fb   :  { %v463_v12 = vadd.f32 %v462_v11, %v460_v48 }
 0x2fd   :  { %v464_v13 = vmul.f32 0.001953125, %v463_v12 }
 0x2ff   :  { %v465_v14 = vmul.f32 %v464_v13, %v464_v13 }
 0x301   :  { %v467_v15 = vrot.slane %v465_v14, 7 }
 0x303   :  { %v469_v16 = vsub.f32 %v464_v13, %v467_v15 }
 0x305   :  { %v471_v17 = vadd.f32 1e-05, %v469_v16 }
 0x307   :  { %1974 = vrsqrt.f32 %v471_v17 }
 0x311   :  { %v1975_v26 = vpop.eup %1974 }
 0x312   :  { %v480_v27 = vrot.slane %v1975_v26, %v2273_v24 }
 0x314   :  { %v481_v28 = vcombine.high %v480_v27, %v480_v27 }
 0x316   :  { %v488_v31 = vrot.slane %v481_v28, %v2273_v24 }
 0x318   :  { %v490_v32 = vmul.f32 %v488_v31, %v470_v29 }
 0x31a   :  { %v492_v34 = vmul.f32 %v490_v32, %v464_v13  ;;  %v498_v35 = vrot.slane %v490_v32, %v2280_v30 }
 0x31c   :  { %v493_v38 = vsub.f32 %v491_v33, %v492_v34  ;;  %v502_v39 = vmul.f32 %v498_v35, %v2254_v20  ;;  %v503_v40 = vmul.f32 %v498_v35, %v2259_v25  ;;  %v500_v42 = vmul.f32 %v498_v35, %v2244_v3 }
 0x31d   :  { %v501_v43 = vmul.f32 %v498_v35, %v2246_v5  ;;  %v521_v20 = vadd.s32 16, %v2270_v23 }
 0x31e   :  { %v508_v41 = vrot.slane %v493_v38, %v2280_v30 }
 0x31f   :  { %v541_v1 = vand.u32 15, %v521_v20 }
 0x320   :  { %v512_v47 = vadd.f32 %v508_v41, %v502_v39  ;;  %v513_v48 = vadd.f32 %v508_v41, %v503_v40  ;;  %v510_v49 = vadd.f32 %v508_v41, %v500_v42  ;;  %v511_v50 = vadd.f32 %v508_v41, %v501_v43 }
 0x321   :  { %vm1744_vm10 = vcmp.ne.s32.totalorder %v541_v1, 0 }
 0x322   :  { %v517_v51 = vmax.f32 %v513_v48, 0.0  ;;  %v514_v25 = vmax.f32 %v510_v49, 0.0  ;;  %v515_v52 = vmax.f32 %v511_v50, 0.0  ;;  %v516_v53 = vmax.f32 %v512_v47, 0.0  ;;  %vm1700_vm11 = vmpackc.low %vm2029_vm6, %vm1744_vm10 }
 0x324   :  { %v571_v55 = vrot.slane %v514_v25, 7  ;;  %v572_v56 = vrot.slane %v515_v52, 7  ;;  %v574_v57 = vrot.slane %v517_v51, 7  ;;  %v623_v58 = vpack.c.bf16 %v515_v52, %v514_v25 }
 0x325   :  { %v580_v59 = vrot.slane %v514_v25, 1  ;;  %v581_v60 = vrot.slane %v515_v52, 1  ;;  %v582_v61 = vrot.slane %v516_v53, 1  ;;  %v583_v62 = vrot.slane %v517_v51, 1 }
 0x326   :  { %v578_v63 = vsel %vm575_vm1, %v571_v55, %v572_v56  ;;  %v579_v0 = vsel %vm575_vm1, %v574_v57, %v571_v55  ;;  %851 = vmatprep.mubr.bf16.mxu0 %v623_v58  ;;  %v624_v10 = vpack.c.bf16 %v517_v51, %v516_v53  ;;  %v573_v11 = vrot.slane %v516_v53, 7 }
 0x327   :  { %v1697_v2 = vpack.c.bf16 %v578_v63, %v579_v0  ;;  %v585_v4 = vsel %vm584_vm3, %v582_v61, %v583_v62  ;;  %v586_v6 = vsel %vm584_vm3, %v581_v60, %v582_v61  ;;  %v587_v7 = vsel %vm584_vm3, %v580_v59, %v581_v60 }
 0x328   :  { %v588_v8 = vsel %vm584_vm3, %v583_v62, %v580_v59  ;;  %v1705_v9 = vpack.c.bf16 %v586_v6, %v587_v7  ;;  %v576_v13 = vsel %vm575_vm1, %v573_v11, %v574_v57  ;;  %v577_v14 = vsel %vm575_vm1, %v572_v56, %v573_v11  ;;  %v1931_v6 = vld [vmem:[%s2699_s3 + $0xc] ss:$16 sps:$4 sm:$0xff]   ;;  %v1926_v7 = vld [vmem:[%s2699_s3] ss:$16 sps:$4 sm:$0xff]  }
 0x329   :  { %1698 = vmatmul.mubr.msk.bf16.vlgmr.msra.gmra.mrb[8].mxu0 %vm1696_vm7, %v1697_v2  ;;  %v1709_v12 = vpack.c.bf16 %v588_v8, %v585_v4  ;;  %v1701_v15 = vpack.c.bf16 %v576_v13, %v577_v14  ;;  %v1928_v4 = vld [vmem:[%s2699_s3 + $0x4] ss:$16 sps:$4 sm:$0xff]   ;;  %v1929_v8 = vld [vmem:[%s2699_s3 + $0x8] ss:$16 sps:$4 sm:$0xff]   ;;  %1253 = vmatprep.subr.bf16.mxu1 %v1931_v6  ;;  %v1932_v11 = vld [vmem:[%s2699_s3 + $0x20] ss:$16 sps:$4 sm:$0xff]  }
 0x32a   :  { %1857 = vmatprep.mubr.msk.bf16.mxu1 %vm1704_vm8, %v1705_v9  ;;  %859 = vmatprep.mubr.bf16.mxu0 %v624_v10  ;;  %v1934_v9 = vld [vmem:[%s2699_s3 + $0x24] ss:$16 sps:$4 sm:$0xff]   ;;  %v1937_v10 = vld [vmem:[%s2699_s3 + $0x2c] ss:$16 sps:$4 sm:$0xff]  }
 0x32b   :  { %1858 = vmatmul.mubr.msk.bf16.vlgmr.msra.gmra.mrb[8].mxu1 %vm1708_vm9, %v1709_v12  ;;  %1200 = vmatprep.subr.bf16.mxu0 %v1928_v4  ;;  %v1935_v12 = vld [vmem:[%s2699_s3 + $0x28] ss:$16 sps:$4 sm:$0xff]   ;;  %v1940_v13 = vld [vmem:[%s2699_s3 + $0x44] ss:$16 sps:$4 sm:$0xff]   ;;  %v1943_v14 = vld [vmem:[%s2699_s3 + $0x4c] ss:$16 sps:$4 sm:$0xff]  }
 0x32c   :  { %1201 = vmatpush1.bf16.msra.mxu0 %v1926_v7  ;;  %1254 = vmatpush1.bf16.msra.mxu1 %v1929_v8 }
 0x32d   :  { %1202 = vmatprep.subr.bf16.mxu0 %v1934_v9  ;;  %1255 = vmatprep.subr.bf16.mxu1 %v1937_v10 }
 0x330   :  { %1203 = vmatpush1.bf16.msra.mxu0 %v1932_v11  ;;  %1256 = vmatpush1.bf16.msra.mxu1 %v1935_v12 }
 0x331   :  { %1702 = vmatmul.mubr.msk.bf16.gmra.mrb[12].mxu0 %vm1700_vm11, %v1701_v15  ;;  %v1938_v15 = vld [vmem:[%s2699_s3 + $0x40] ss:$16 sps:$4 sm:$0xff]   ;;  %1204 = vmatprep.subr.bf16.mxu0 %v1940_v13 }
 0x332   :  { %1257 = vmatprep.subr.bf16.mxu1 %v1943_v14 }
 0x334   :  { %1205 = vmatpush1.bf16.msra.mxu0 %v1938_v15 }
 0x3fc   :  { %v1819_v16 = vpop.f32.mrb[8].mxu0 }
 0x3fd   :  { %v1820_v17 = vpop.f32.mrb[9].mxu0 }
 0x3fe   :  { %v1821_v18 = vadd.f32 %v1820_v17, %v1819_v16  ;;  %v1859_v19 = vpop.f32.mrb[8].mxu1  ;;  %v1822_v22 = vpop.f32.mrb[10].mxu0  ;;  %v1941_v16 = vld [vmem:[%s2699_s3 + $0x48] ss:$16 sps:$4 sm:$0xff]   ;;  %v1946_v17 = vld [vmem:[%s2699_s3 + $0x64] ss:$16 sps:$4 sm:$0xff]  }
 0x3ff   :  { %v902_v26 = vpop.f32.mrb[9].mxu1  ;;  %v1823_v27 = vpop.f32.mrb[11].mxu0  ;;  %1258 = vmatpush1.bf16.msra.mxu1 %v1941_v16  ;;  %1206 = vmatprep.subr.bf16.mxu0 %v1946_v17 }
 0x400   :  { %v2336_v28 = vadd.f32 %v1821_v18, %v902_v26  ;;  %v1824_v29 = vadd.f32 %v1823_v27, %v1822_v22  ;;  %v1860_v31 = vpop.f32.mrb[10].mxu1  ;;  %v1949_v18 = vld [vmem:[%s2699_s3 + $0x6c] ss:$16 sps:$4 sm:$0xff]   ;;  %v1947_v22 = vld [vmem:[%s2699_s3 + $0x68] ss:$16 sps:$4 sm:$0xff]  }
 0x401   :  { %v905_v32 = vpop.f32.mrb[11].mxu1  ;;  %1259 = vmatprep.subr.bf16.mxu1 %v1949_v18  ;;  %v1952_v26 = vld [vmem:[%s2699_s3 + $0x84] ss:$16 sps:$4 sm:$0xff]   ;;  %v1955_v27 = vld [vmem:[%s2699_s3 + $0x8c] ss:$16 sps:$4 sm:$0xff]  }
 0x402   :  { %v2338_v33 = vadd.f32 %v1824_v29, %v905_v32  ;;  %v926_v40 = vmul.f32 %v2336_v28, %v2336_v28  ;;  %v1950_v29 = vld [vmem:[%s2699_s3 + $0x80] ss:$16 sps:$4 sm:$0xff]   ;;  %v1958_v32 = vld [vmem:[%s2699_s3 + $0xa4] ss:$16 sps:$4 sm:$0xff]  }
 0x403   :  { %1260 = vmatpush1.bf16.msra.mxu1 %v1947_v22 }
 0x404   :  { %v1825_v34 = vpop.f32.mrb[12].mxu0  ;;  %v927_v36 = vmul.f32 %v2338_v33, %v2338_v33  ;;  %v917_v41 = vadd.f32 %v2338_v33, %v2336_v28  ;;  %1261 = vmatprep.subr.bf16.mxu1 %v1955_v27 }
 0x405   :  { %v1826_v35 = vpop.f32.mrb[13].mxu0 }
 0x406   :  { %v1827_v37 = vadd.f32 %v1826_v35, %v1825_v34  ;;  %v1828_v38 = vpop.f32.mrb[14].mxu0  ;;  %v930_v44 = vadd.f32 %v927_v36, %v926_v40  ;;  %v1961_v34 = vld [vmem:[%s2699_s3 + $0xac] ss:$16 sps:$4 sm:$0xff]   ;;  %v1956_v35 = vld [vmem:[%s2699_s3 + $0xa0] ss:$16 sps:$4 sm:$0xff]  }
 0x407   :  { %v1829_v39 = vpop.f32.mrb[15].mxu0  ;;  %v1959_v36 = vld [vmem:[%s2699_s3 + $0xa8] ss:$16 sps:$4 sm:$0xff]   ;;  %v1967_v40 = vld [vmem:[%s2699_s3 + $0xcc] ss:$16 sps:$4 sm:$0xff]  }
 0x408   :  { %v2346_v42 = vadd.f32 %v1859_v19, %v1827_v37  ;;  %v1830_v43 = vadd.f32 %v1829_v39, %v1828_v38  ;;  %v1944_v19 = vld [vmem:[%s2699_s3 + $0x60] ss:$16 sps:$4 sm:$0xff]   ;;  %v1964_v38 = vld [vmem:[%s2699_s3 + $0xc4] ss:$16 sps:$4 sm:$0xff]   ;;  %v1965_v39 = vld [vmem:[%s2699_s3 + $0xc8] ss:$16 sps:$4 sm:$0xff]  }
 0x409   :  { %1207 = vmatpush1.bf16.msra.mxu0 %v1944_v19  ;;  %v1962_v37 = vld [vmem:[%s2699_s3 + $0xc0] ss:$16 sps:$4 sm:$0xff]  }
 0x40a   :  { %v918_v45 = vadd.f32 %v917_v41, %v2346_v42  ;;  %v928_v46 = vmul.f32 %v2346_v42, %v2346_v42  ;;  %v2351_v47 = vadd.f32 %v1860_v31, %v1830_v43  ;;  %v1953_v31 = vld [vmem:[%s2699_s3 + $0x88] ss:$16 sps:$4 sm:$0xff]   ;;  %1208 = vmatprep.subr.bf16.mxu0 %v1952_v26  ;;  %v1970_v41 = vld [vmem:[%s2699_s3 + $0xe4] ss:$16 sps:$4 sm:$0xff]   ;;  %v1973_v43 = vld [vmem:[%s2699_s3 + $0xec] ss:$16 sps:$4 sm:$0xff]  }
 0x40b   :  { %1262 = vmatpush1.bf16.msra.mxu1 %v1953_v31 }
 0x40c   :  { %v931_v48 = vadd.f32 %v930_v44, %v928_v46  ;;  %v919_v49 = vadd.f32 %v918_v45, %v2351_v47  ;;  %v929_v50 = vmul.f32 %v2351_v47, %v2351_v47  ;;  %1263 = vmatprep.subr.bf16.mxu1 %v1961_v34  ;;  %v1968_v44 = vld [vmem:[%s2699_s3 + $0xe0] ss:$16 sps:$4 sm:$0xff]   ;;  %v1971_v45 = vld [vmem:[%s2699_s3 + $0xe8] ss:$16 sps:$4 sm:$0xff]   ;;  %v2030_v46 = vmov 0  }
 0x40d   :  { %1209 = vmatpush1.bf16.msra.mxu0 %v1950_v29  ;;  %1232 = vmatprep.mubr.bf16.mxu0 %v2030_v46 }
 0x40e   :  { %v920_v20 = vrot.slane %v919_v49, 4  ;;  %v932_v51 = vadd.f32 %v931_v48, %v929_v50  ;;  %1210 = vmatprep.subr.bf16.mxu0 %v1958_v32  ;;  %1285 = vmatprep.mubr.bf16.mxu1 %v2030_v46 }
 0x40f   :  { %1264 = vmatpush1.bf16.msra.mxu1 %v1959_v36 }
 0x410   :  { %v921_v25 = vadd.f32 %v920_v20, %v919_v49  ;;  %v933_v52 = vrot.slane %v932_v51, 4  ;;  %1265 = vmatprep.subr.bf16.mxu1 %v1967_v40 }
 0x411   :  { %1211 = vmatpush1.bf16.msra.mxu0 %v1956_v35 }
 0x412   :  { %v922_v53 = vrot.slane %v921_v25, 2  ;;  %v934_v3 = vadd.f32 %v933_v52, %v932_v51  ;;  %1212 = vmatprep.subr.bf16.mxu0 %v1964_v38 }
 0x413   :  { %1266 = vmatpush1.bf16.msra.mxu1 %v1965_v39 }
 0x414   :  { %v923_v5 = vadd.f32 %v922_v53, %v921_v25  ;;  %v935_v54 = vrot.slane %v934_v3, 2  ;;  %1267 = vmatprep.subr.bf16.mxu1 %v1973_v43 }
 0x415   :  { %1213 = vmatpush1.bf16.msra.mxu0 %v1962_v37 }
 0x416   :  { %v924_v55 = vrot.slane %v923_v5, 1  ;;  %v936_v56 = vadd.f32 %v935_v54, %v934_v3  ;;  %1214 = vmatprep.subr.bf16.mxu0 %v1970_v41  ;;  %v958_v54 = vld [vmem:[%s2702_s6] sm:$0x1] }
 0x417   :  { %1268 = vmatpush1.bf16.msra.mxu1 %v1971_v45 }
 0x418   :  { %v937_v57 = vrot.slane %v936_v56, 1  ;;  %v925_v58 = vadd.f32 %v924_v55, %v923_v5 }
 0x419   :  { %1215 = vmatpush1.bf16.msra.mxu0 %v1968_v44 }
 0x41a   :  { %v938_v59 = vadd.f32 %v937_v57, %v936_v56  ;;  %v979_v57 = vld [vmem:[%s2703_s7] sm:$0x1] }
 0x41c   :  { %v939_v60 = vsel %vm450_vm0, %v925_v58, %v938_v59 }
 0x41d   :  { %940 = vrot.lane.b32.xlu0 %v939_v60, %s2025_s20 }
 0x48f   :  { %v941_v61 = vpop.permute.xlu0 %940 }
 0x490   :  { %v942_v62 = vadd.f32 %v941_v61, %v939_v60 }
 0x492   :  { %943 = vrot.lane.b32.xlu1 %v942_v62, %s2026_s21 }
 0x504   :  { %v944_v63 = vpop.permute.xlu1 %943 }
 0x505   :  { %v945_v0 = vadd.f32 %v944_v63, %v942_v62 }
 0x507   :  { %946 = vrot.lane.b32.xlu0 %v945_v0, %s2027_s22 }
 0x579   :  { %v947_v1 = vpop.permute.xlu0 %946 }
 0x57a   :  { %v2360_v2 = vadd.f32 %v947_v1, %v945_v0 }
 0x57c   :  { %949 = vrot.lane.b32.xlu1 %v2360_v2, %s2023_s23 }
 0x5ee   :  { %v950_v48 = vpop.permute.xlu1 %949 }
 0x5ef   :  { %v951_v49 = vadd.f32 %v950_v48, %v2360_v2 }
 0x5f1   :  { %v952_v50 = vmul.f32 0.001953125, %v951_v49 }
 0x5f3   :  { %v953_v20 = vmul.f32 %v952_v50, %v952_v50 }
 0x5f5   :  { %v955_v51 = vrot.slane %v953_v20, 7 }
 0x5f7   :  { %v957_v25 = vsub.f32 %v952_v50, %v955_v51 }
 0x5f9   :  { %v959_v52 = vadd.f32 1e-05, %v957_v25 }
 0x5fb   :  { %1976 = vrsqrt.f32 %v959_v52 }
 0x605   :  { %v1977_v53 = vpop.eup %1976 }
 0x606   :  { %v968_v3 = vrot.slane %v1977_v53, %v2273_v24 }
 0x608   :  { %v969_v5 = vcombine.high %v968_v3, %v968_v3 }
 0x60a   :  { %v976_v55 = vrot.slane %v969_v5, %v2273_v24 }
 0x60c   :  { %v978_v56 = vmul.f32 %v976_v55, %v958_v54 }
 0x60e   :  { %v980_v58 = vmul.f32 %v978_v56, %v952_v50  ;;  %v986_v59 = vrot.slane %v978_v56, %v2280_v30 }
 0x610   :  { %v981_v60 = vsub.f32 %v979_v57, %v980_v58  ;;  %v988_v62 = vmul.f32 %v986_v59, %v2336_v28  ;;  %v989_v63 = vmul.f32 %v986_v59, %v2338_v33  ;;  %v990_v6 = vmul.f32 %v986_v59, %v2346_v42 }
 0x611   :  { %v991_v7 = vmul.f32 %v986_v59, %v2351_v47 }
 0x612   :  { %v996_v61 = vrot.slane %v981_v60, %v2280_v30 }
 0x614   :  { %v998_v0 = vadd.f32 %v996_v61, %v988_v62  ;;  %v999_v1 = vadd.f32 %v996_v61, %v989_v63  ;;  %v1000_v9 = vadd.f32 %v996_v61, %v990_v6  ;;  %v1001_v10 = vadd.f32 %v996_v61, %v991_v7 }
 0x616   :  { %v1002_v2 = vmax.f32 %v998_v0, 0.0  ;;  %v1003_v4 = vmax.f32 %v999_v1, 0.0  ;;  %v1004_v11 = vmax.f32 %v1000_v9, 0.0  ;;  %v1005_v12 = vmax.f32 %v1001_v10, 0.0 }
 0x618   :  { %v1006_v8 = vpack.c.bf16 %v1003_v4, %v1002_v2  ;;  %v1007_v28 = vpack.c.bf16 %v1005_v12, %v1004_v11 }
 0x61a   :  { %1233 = vmatmul.mubr.bf16.vlgmr.msra.gmra.mrb[16].mxu0 %v1006_v8  ;;  %1286 = vmatmul.mubr.bf16.vlgmr.msra.gmra.mrb[12].mxu1 %v1006_v8 }
 0x61b   :  { %1242 = vmatprep.mubr.bf16.mxu0 %v2030_v46  ;;  %1295 = vmatprep.mubr.bf16.mxu1 %v2030_v46 }
 0x622   :  { %1243 = vmatmul.mubr.bf16.gmra.mrb[20].mxu0 %v1007_v28  ;;  %1296 = vmatmul.mubr.bf16.gmra.mrb[16].mxu1 %v1007_v28 }
 0x6ed   :  { %v2475_v33 = vpop.f32.mrb[16].mxu0  ;;  %v2477_v13 = vpop.f32.mrb[12].mxu1 }
 0x6ee   :  { %v2479_v14 = vpop.f32.mrb[17].mxu0  ;;  %v2481_v42 = vpop.f32.mrb[13].mxu1  ;;  %v1342_v47 = vmul.f32 %v2475_v33, %v2475_v33  ;;  %v1344_v15 = vmul.f32 %v2477_v13, %v2477_v13 }
 0x6ef   :  { %v1343_v16 = vmul.f32 %v2479_v14, %v2479_v14  ;;  %v1345_v17 = vmul.f32 %v2481_v42, %v2481_v42  ;;  %v2491_v18 = vpop.f32.mrb[18].mxu0  ;;  %v2493_v19 = vpop.f32.mrb[14].mxu1 }
 0x6f0   :  { %v1306_v22 = vadd.f32 %v2491_v18, %v2475_v33  ;;  %v1346_v26 = vmul.f32 %v2491_v18, %v2491_v18  ;;  %v1324_v27 = vadd.f32 %v2493_v19, %v2477_v13  ;;  %v1348_v29 = vmul.f32 %v2493_v19, %v2493_v19  ;;  %v2503_v31 = vpop.f32.mrb[19].mxu0  ;;  %v2505_v32 = vpop.f32.mrb[15].mxu1 }
 0x6f1   :  { %v1315_v34 = vadd.f32 %v2503_v31, %v2479_v14  ;;  %v1347_v35 = vmul.f32 %v2503_v31, %v2503_v31  ;;  %v1333_v36 = vadd.f32 %v2505_v32, %v2481_v42  ;;  %v1349_v37 = vmul.f32 %v2505_v32, %v2505_v32 }
 0x6f2   :  { %v1358_v38 = vadd.f32 %v1346_v26, %v1342_v47  ;;  %v1376_v39 = vadd.f32 %v1348_v29, %v1344_v15 }
 0x6f3   :  { %v1367_v40 = vadd.f32 %v1347_v35, %v1343_v16  ;;  %v1385_v41 = vadd.f32 %v1349_v37, %v1345_v17 }
 0x6f5   :  { %v2515_v43 = vpop.f32.mrb[20].mxu0  ;;  %v2517_v44 = vpop.f32.mrb[16].mxu1 }
 0x6f6   :  { %v1307_v45 = vadd.f32 %v1306_v22, %v2515_v43  ;;  %v1350_v46 = vmul.f32 %v2515_v43, %v2515_v43  ;;  %v1325_v48 = vadd.f32 %v1324_v27, %v2517_v44  ;;  %v1352_v49 = vmul.f32 %v2517_v44, %v2517_v44  ;;  %v2525_v50 = vpop.f32.mrb[21].mxu0  ;;  %v2527_v20 = vpop.f32.mrb[17].mxu1 }
 0x6f7   :  { %v1316_v51 = vadd.f32 %v1315_v34, %v2525_v50  ;;  %v1351_v25 = vmul.f32 %v2525_v50, %v2525_v50  ;;  %v1334_v52 = vadd.f32 %v1333_v36, %v2527_v20  ;;  %v1353_v53 = vmul.f32 %v2527_v20, %v2527_v20  ;;  %v2535_v3 = vpop.f32.mrb[22].mxu0  ;;  %v2537_v5 = vpop.f32.mrb[18].mxu1 }
 0x6f8   :  { %v1359_v54 = vadd.f32 %v1358_v38, %v1350_v46  ;;  %v1377_v55 = vadd.f32 %v1376_v39, %v1352_v49  ;;  %v1308_v56 = vadd.f32 %v1307_v45, %v2535_v3  ;;  %v1354_v57 = vmul.f32 %v2535_v3, %v2535_v3  ;;  %v2542_v58 = vpop.f32.mrb[23].mxu0  ;;  %v2544_v59 = vpop.f32.mrb[19].mxu1 }
 0x6f9   :  { %v1368_v60 = vadd.f32 %v1367_v40, %v1351_v25  ;;  %v1386_v61 = vadd.f32 %v1385_v41, %v1353_v53  ;;  %v1326_v62 = vadd.f32 %v1325_v48, %v2537_v5  ;;  %v1356_v63 = vmul.f32 %v2537_v5, %v2537_v5 }
 0x6fa   :  { %v1309_v0 = vrot.slane %v1308_v56, 4  ;;  %v1360_v1 = vadd.f32 %v1359_v54, %v1354_v57  ;;  %v1317_v2 = vadd.f32 %v1316_v51, %v2542_v58  ;;  %v1355_v4 = vmul.f32 %v2542_v58, %v2542_v58 }
 0x6fb   :  { %v1327_v6 = vrot.slane %v1326_v62, 4  ;;  %v1378_v7 = vadd.f32 %v1377_v55, %v1356_v63  ;;  %v1335_v8 = vadd.f32 %v1334_v52, %v2544_v59  ;;  %v1357_v9 = vmul.f32 %v2544_v59, %v2544_v59 }
 0x6fc   :  { %v1310_v10 = vadd.f32 %v1309_v0, %v1308_v56  ;;  %v1361_v11 = vrot.slane %v1360_v1, 4  ;;  %v1318_v12 = vrot.slane %v1317_v2, 4  ;;  %v1369_v28 = vadd.f32 %v1368_v60, %v1355_v4 }
 0x6fd   :  { %v1328_v47 = vadd.f32 %v1327_v6, %v1326_v62  ;;  %v1379_v15 = vrot.slane %v1378_v7, 4  ;;  %v1336_v16 = vrot.slane %v1335_v8, 4  ;;  %v1387_v17 = vadd.f32 %v1386_v61, %v1357_v9 }
 0x6fe   :  { %v1311_v22 = vrot.slane %v1310_v10, 2  ;;  %v1362_v26 = vadd.f32 %v1361_v11, %v1360_v1  ;;  %v1319_v27 = vadd.f32 %v1318_v12, %v1317_v2  ;;  %v1370_v29 = vrot.slane %v1369_v28, 4 }
 0x6ff   :  { %v1329_v34 = vrot.slane %v1328_v47, 2  ;;  %v1380_v35 = vadd.f32 %v1379_v15, %v1378_v7  ;;  %v1337_v36 = vadd.f32 %v1336_v16, %v1335_v8  ;;  %v1388_v37 = vrot.slane %v1387_v17, 4 }
 0x700   :  { %v1312_v38 = vadd.f32 %v1311_v22, %v1310_v10  ;;  %v1363_v39 = vrot.slane %v1362_v26, 2  ;;  %v1320_v40 = vrot.slane %v1319_v27, 2  ;;  %v1371_v41 = vadd.f32 %v1370_v29, %v1369_v28 }
 0x701   :  { %v1330_v45 = vadd.f32 %v1329_v34, %v1328_v47  ;;  %v1381_v46 = vrot.slane %v1380_v35, 2  ;;  %v1338_v48 = vrot.slane %v1337_v36, 2  ;;  %v1389_v49 = vadd.f32 %v1388_v37, %v1387_v17 }
 0x702   :  { %v1321_v51 = vadd.f32 %v1320_v40, %v1319_v27  ;;  %v1372_v25 = vrot.slane %v1371_v41, 2  ;;  %v1313_v52 = vrot.slane %v1312_v38, 1  ;;  %v1364_v53 = vadd.f32 %v1363_v39, %v1362_v26 }
 0x703   :  { %v1339_v54 = vadd.f32 %v1338_v48, %v1337_v36  ;;  %v1390_v55 = vrot.slane %v1389_v49, 2  ;;  %v1331_v56 = vrot.slane %v1330_v45, 1  ;;  %v1382_v57 = vadd.f32 %v1381_v46, %v1380_v35 }
 0x704   :  { %v1322_v60 = vrot.slane %v1321_v51, 1  ;;  %v1373_v61 = vadd.f32 %v1372_v25, %v1371_v41  ;;  %v1365_v62 = vrot.slane %v1364_v53, 1  ;;  %v1314_v2 = vadd.f32 %v1313_v52, %v1312_v38 }
 0x705   :  { %v1340_v63 = vrot.slane %v1339_v54, 1  ;;  %v1391_v0 = vadd.f32 %v1390_v55, %v1389_v49  ;;  %v1383_v1 = vrot.slane %v1382_v57, 1  ;;  %v1332_v7 = vadd.f32 %v1331_v56, %v1330_v45 }
 0x706   :  { %v1366_v4 = vadd.f32 %v1365_v62, %v1364_v53  ;;  %v1374_v6 = vrot.slane %v1373_v61, 1  ;;  %v1323_v11 = vadd.f32 %v1322_v60, %v1321_v51  ;;  %v1407_v22 = vand.u32 127, %v477_v21 }
 0x707   :  { %v1384_v8 = vadd.f32 %v1383_v1, %v1382_v57  ;;  %v1392_v9 = vrot.slane %v1391_v0, 1  ;;  %v1341_v47 = vadd.f32 %v1340_v63, %v1339_v54 }
 0x708   :  { %v1394_v10 = vsel %vm450_vm0, %v1314_v2, %v1366_v4  ;;  %v1375_v12 = vadd.f32 %v1374_v6, %v1373_v61  ;;  %vm1408_vm12 = vcmp.lt.s32.totalorder %v1407_v22, 32  ;;  %vm1425_vm13 = vcmp.lt.s32.totalorder %v1407_v22, 64 }
 0x709   :  { %1398 = vrot.lane.b32.xlu0 %v1394_v10, %s2027_s22  ;;  %v1396_v28 = vsel %vm450_vm0, %v1332_v7, %v1384_v8  ;;  %v1393_v15 = vadd.f32 %v1392_v9, %v1391_v0 }
 0x70a   :  { %v1395_v16 = vsel %vm450_vm0, %v1323_v11, %v1375_v12 }
 0x70b   :  { %1400 = vrot.lane.b32.xlu1 %v1395_v16, %s2027_s22  ;;  %v1397_v17 = vsel %vm450_vm0, %v1341_v47, %v1393_v15 }
 0x70d   :  { %1402 = vrot.lane.b32.xlu0 %v1396_v28, %s2027_s22 }
 0x70f   :  { %1404 = vrot.lane.b32.xlu1 %v1397_v17, %s2027_s22 }
 0x77b   :  { %v1399_v26 = vpop.permute.xlu0 %1398 }
 0x77d   :  { %v1401_v27 = vpop.permute.xlu1 %1400 }
 0x77e   :  { %v1411_v29 = vsel %vm1408_vm12, %v1399_v26, %v1401_v27 }
 0x77f   :  { %v1403_v34 = vpop.permute.xlu0 %1402  ;;  %v1414_v35 = vadd.f32 %v1411_v29, %v1395_v16  ;;  %v1489_v29 = vsub.s32 2, %v2270_v23 }
 0x780   :  { %v1410_v41 = vsel %vm1408_vm12, %v1401_v27, %v1403_v34  ;;  %v1485_v27 = vsub.s32 1, %v2270_v23 }
 0x781   :  { %1419 = vrot.lane.b32.xlu1 %v1414_v35, %s2023_s23  ;;  %v1405_v36 = vpop.permute.xlu1 %1404  ;;  %v1415_v45 = vadd.f32 %v1410_v41, %v1396_v28 }
 0x782   :  { %v1409_v37 = vsel %vm1408_vm12, %v1403_v34, %v1405_v36  ;;  %v1412_v38 = vsel %vm1408_vm12, %v1405_v36, %v1399_v26  ;;  %v1452_v26 = vld [vmem:[%s2704_s8] sm:$0xf]  ;;  %v1493_v34 = vsub.s32 3, %v2270_v23 }
 0x783   :  { %v1413_v39 = vadd.f32 %v1412_v38, %v1394_v10  ;;  %v1416_v40 = vadd.f32 %v1409_v37, %v1397_v17  ;;  %v1477_v23 = vld [vmem:[%s2705_s9] sm:$0xf] }
 0x785   :  { %1417 = vrot.lane.b32.xlu0 %v1413_v39, %s2023_s23  ;;  %1423 = vrot.lane.b32.xlu1 %v1416_v40, %s2023_s23 }
 0x789   :  { %1421 = vrot.lane.b32.xlu0 %v1415_v45, %s2023_s23 }
 0x7f3   :  { %v1420_v21 = vpop.permute.xlu1 %1419 }
 0x7f7   :  { %v1418_v46 = vpop.permute.xlu0 %1417  ;;  %v1424_v48 = vpop.permute.xlu1 %1423 }
 0x7f8   :  { %v1428_v49 = vsel %vm1425_vm13, %v1418_v46, %v1420_v21  ;;  %v1429_v51 = vsel %vm1425_vm13, %v1424_v48, %v1418_v46 }
 0x7f9   :  { %v1431_v25 = vadd.f32 %v1428_v49, %v1414_v35  ;;  %v1430_v52 = vadd.f32 %v1429_v51, %v1413_v39 }
 0x7fb   :  { %v1422_v53 = vpop.permute.xlu0 %1421  ;;  %v1435_v60 = vadd.f32 %v1431_v25, %v1430_v52 }
 0x7fc   :  { %v1426_v54 = vsel %vm1425_vm13, %v1422_v53, %v1424_v48  ;;  %v1427_v55 = vsel %vm1425_vm13, %v1420_v21, %v1422_v53 }
 0x7fd   :  { %v1432_v56 = vadd.f32 %v1427_v55, %v1415_v45  ;;  %v1433_v57 = vadd.f32 %v1426_v54, %v1416_v40 }
 0x7ff   :  { %v1434_v61 = vadd.f32 %v1433_v57, %v1430_v52  ;;  %v1436_v62 = vadd.f32 %v1432_v56, %v1431_v25  ;;  %v1437_v63 = vadd.f32 %v1433_v57, %v1432_v56 }
 0x801   :  { %v1438_v0 = vadd.f32 %v1436_v62, %v1434_v61  ;;  %v1439_v1 = vadd.f32 %v1437_v63, %v1435_v60 }
 0x803   :  { %v1440_v2 = vmul.f32 0.001953125, %v1438_v0  ;;  %v1441_v4 = vmul.f32 0.001953125, %v1439_v1 }
 0x805   :  { %v1442_v6 = vmul.f32 %v1440_v2, %v1440_v2  ;;  %v1443_v7 = vmul.f32 %v1441_v4, %v1441_v4 }
 0x807   :  { %v1446_v8 = vrot.slane %v1442_v6, 7  ;;  %v1447_v9 = vrot.slane %v1443_v7, 7 }
 0x809   :  { %v1450_v10 = vsub.f32 %v1440_v2, %v1446_v8  ;;  %v1451_v11 = vsub.f32 %v1441_v4, %v1447_v9 }
 0x80b   :  { %v1453_v12 = vadd.f32 1e-05, %v1450_v10  ;;  %v1454_v28 = vadd.f32 1e-05, %v1451_v11 }
 0x80d   :  { %1978 = vrsqrt.f32 %v1453_v12 }
 0x80e   :  { %1980 = vrsqrt.f32 %v1454_v28 }
 0x817   :  { %v1979_v47 = vpop.eup %1978 }
 0x818   :  { %v1981_v15 = vpop.eup %1980 }
 0x819   :  { %v1459_v16 = vcombine.low %v1979_v47, %v1981_v15  ;;  %v1983_v15 = vld [vmem:[%s2696_s0 + $0x8] sm:$0xff] }
 0x81b   :  { %v1466_v17 = vrot.slane %v1459_v16, %v2273_v24 }
 0x81d   :  { %v1467_v22 = vcombine.high %v1466_v17, %v1466_v17  ;;  %v1984_v17 = vld [vmem:[%s2696_s0 + $0x10] sm:$0xff] }
 0x81f   :  { %v1474_v35 = vrot.slane %v1467_v22, %v2273_v24 }
 0x821   :  { %v1476_v36 = vmul.f32 %v1474_v35, %v1452_v26  ;;  %v1985_v26 = vld [vmem:[%s2696_s0 + $0x18] sm:$0xff]  ;;  %v1987_v35 = vld [vmem:[%s2696_s0 + $0x28] sm:$0xff] }
 0x823   :  { %v1482_v37 = vrot.slane %v1476_v36, %v2280_v30  ;;  %v1486_v38 = vrot.slane %v1476_v36, %v1485_v27  ;;  %v1490_v39 = vrot.slane %v1476_v36, %v1489_v29  ;;  %v1494_v40 = vrot.slane %v1476_v36, %v1493_v34 }
 0x825   :  { %v1499_v41 = vmul.f32 %v1482_v37, %v1440_v2  ;;  %v1500_v45 = vmul.f32 %v1486_v38, %v1441_v4  ;;  %v1501_v21 = vmul.f32 %v1490_v39, %v1440_v2  ;;  %v1502_v46 = vmul.f32 %v1494_v40, %v1441_v4 }
 0x826   :  { %v1533_v54 = vmul.f32 %v1482_v37, %v2475_v33  ;;  %v1534_v55 = vmul.f32 %v1486_v38, %v2479_v14  ;;  %v1535_v56 = vmul.f32 %v1490_v39, %v2477_v13  ;;  %v1536_v57 = vmul.f32 %v1494_v40, %v2481_v42 }
 0x827   :  { %v1507_v48 = vcombine.low %v1499_v41, %v1500_v45  ;;  %v1508_v49 = vcombine.low %v1501_v21, %v1502_v46  ;;  %v1537_v60 = vmul.f32 %v1482_v37, %v2491_v18  ;;  %v1538_v62 = vmul.f32 %v1486_v38, %v2503_v31  ;;  %v1990_v41 = vld [vmem:[%s2696_s0 + $0x40] sm:$0xff]  ;;  %v1991_v21 = vld [vmem:[%s2696_s0 + $0x48] sm:$0xff] }
 0x828   :  { %v1539_v63 = vmul.f32 %v1490_v39, %v2493_v19  ;;  %v1540_v0 = vmul.f32 %v1494_v40, %v2505_v32  ;;  %v1541_v1 = vmul.f32 %v1482_v37, %v2515_v43  ;;  %v1543_v33 = vmul.f32 %v1490_v39, %v2517_v44 }
 0x829   :  { %v1515_v51 = vrot.slane %v1507_v48, %v2273_v24  ;;  %v1522_v25 = vrot.slane %v1508_v49, %v2273_v24  ;;  %v1544_v14 = vmul.f32 %v1494_v40, %v2527_v20  ;;  %v1545_v4 = vmul.f32 %v1482_v37, %v2535_v3  ;;  %v1988_v37 = vld [vmem:[%s2696_s0 + $0x30] sm:$0xff] }
 0x82a   :  { %v1546_v31 = vmul.f32 %v1486_v38, %v2542_v58  ;;  %v1547_v19 = vmul.f32 %v1490_v39, %v2537_v5  ;;  %v1548_v32 = vmul.f32 %v1494_v40, %v2544_v59  ;;  %v1982_v5 = vld [vmem:[%s2696_s0] sm:$0xff]  ;;  %v1989_v39 = vld [vmem:[%s2696_s0 + $0x38] sm:$0xff]  ;;  %v1992_v48 = vld [vmem:[%s2696_s0 + $0x50] sm:$0xff] }
 0x82b   :  { %v1523_v52 = vcombine.low %v1515_v51, %v1522_v25  ;;  %v1993_v51 = vld [vmem:[%s2696_s0 + $0x58] sm:$0xff] }
 0x82d   :  { %v1530_v53 = vrot.slane %v1523_v52, %v2273_v24  ;;  %v1542_v24 = vmul.f32 %v1486_v38, %v2525_v50  ;;  %v1994_v52 = vld [vmem:[%s2696_s0 + $0x60] sm:$0xff] }
 0x82f   :  { %v1532_v61 = vsub.f32 %v1477_v23, %v1530_v53  ;;  %v1995_v53 = vld [vmem:[%s2696_s0 + $0x68] sm:$0xff] }
 0x831   :  { %v1553_v13 = vrot.slane %v1532_v61, %v2280_v30  ;;  %v1557_v42 = vrot.slane %v1532_v61, %v1485_v27  ;;  %v1561_v2 = vrot.slane %v1532_v61, %v1489_v29  ;;  %v1565_v18 = vrot.slane %v1532_v61, %v1493_v34  ;;  %v1986_v29 = vld [vmem:[%s2696_s0 + $0x20] sm:$0xff] }
 0x833   :  { %v1570_v43 = vadd.f32 %v1553_v13, %v1533_v54  ;;  %v1571_v6 = vadd.f32 %v1557_v42, %v1534_v55  ;;  %v1572_v50 = vadd.f32 %v1561_v2, %v1535_v56  ;;  %v1573_v7 = vadd.f32 %v1565_v18, %v1536_v57  ;;  %v1996_v55 = vld [vmem:[%s2696_s0 + $0x70] sm:$0xff]  ;;  %v1997_v57 = vld [vmem:[%s2696_s0 + $0x78] sm:$0xff] }
 0x834   :  { %v1574_v44 = vadd.f32 %v1553_v13, %v1537_v60  ;;  %v1575_v8 = vadd.f32 %v1557_v42, %v1538_v62  ;;  %v1576_v20 = vadd.f32 %v1561_v2, %v1539_v63  ;;  %v1577_v9 = vadd.f32 %v1565_v18, %v1540_v0 }
 0x835   :  { %v1578_v30 = vadd.f32 %v1553_v13, %v1541_v1  ;;  %v1579_v10 = vadd.f32 %v1557_v42, %v1542_v24  ;;  %v1580_v11 = vadd.f32 %v1561_v2, %v1543_v33  ;;  %v1581_v12 = vadd.f32 %v1565_v18, %v1544_v14 }
 0x836   :  { %v1582_v28 = vadd.f32 %v1553_v13, %v1545_v4  ;;  %v1583_v3 = vadd.f32 %v1557_v42, %v1546_v31  ;;  %v1584_v47 = vadd.f32 %v1561_v2, %v1547_v19  ;;  %v1585_v58 = vadd.f32 %v1565_v18, %v1548_v32 }
 0x837   :  { %v1586_v59 = vadd.f32 %v1982_v5, %v1570_v43  ;;  %v1587_v16 = vadd.f32 %v1983_v15, %v1571_v6  ;;  %v1588_v22 = vadd.f32 %v1984_v17, %v1572_v50  ;;  %v1589_v27 = vadd.f32 %v1985_v26, %v1573_v7 }
 0x838   :  { %v1590_v34 = vadd.f32 %v1986_v29, %v1574_v44  ;;  %v1591_v36 = vadd.f32 %v1987_v35, %v1575_v8  ;;  %v1592_v38 = vadd.f32 %v1988_v37, %v1576_v20  ;;  %v1593_v40 = vadd.f32 %v1989_v39, %v1577_v9 }
 0x839   :  { %v1594_v45 = vadd.f32 %v1990_v41, %v1578_v30  ;;  %v1595_v46 = vadd.f32 %v1991_v21, %v1579_v10  ;;  %v1596_v49 = vadd.f32 %v1992_v48, %v1580_v11  ;;  %v1597_v25 = vadd.f32 %v1993_v51, %v1581_v12 }
 0x83a   :  { %v1598_v23 = vadd.f32 %v1994_v52, %v1582_v28  ;;  %v1599_v54 = vadd.f32 %v1995_v53, %v1583_v3  ;;  %v1600_v56 = vadd.f32 %v1996_v55, %v1584_v47  ;;  %v1601_v60 = vadd.f32 %v1997_v57, %v1585_v58 }
 0x83b   :  { %v1602_v61 = vmax.f32 %v1586_v59, 0.0  ;;  %v1603_v62 = vmax.f32 %v1587_v16, 0.0  ;;  %v1604_v63 = vmax.f32 %v1588_v22, 0.0  ;;  %v1605_v0 = vmax.f32 %v1589_v27, 0.0 }
 0x83c   :  { %v1606_v1 = vmax.f32 %v1590_v34, 0.0  ;;  %v1607_v24 = vmax.f32 %v1591_v36, 0.0  ;;  %v1608_v33 = vmax.f32 %v1592_v38, 0.0  ;;  %v1609_v14 = vmax.f32 %v1593_v40, 0.0 }
 0x83d   :  { %v1610_v13 = vmax.f32 %v1594_v45, 0.0  ;;  %v1611_v42 = vmax.f32 %v1595_v46, 0.0  ;;  %v1612_v2 = vmax.f32 %v1596_v49, 0.0  ;;  %v1613_v18 = vmax.f32 %v1597_v25, 0.0  ;;  %1618 = vst [vmem:[%s2706_s10] sm:$0xff] %v1602_v61  ;;  %1619 = vst [vmem:[%s2706_s10 + $0x8] sm:$0xff] %v1603_v62 }
 0x83e   :  { %1620 = vst [vmem:[%s2706_s10 + $0x10] sm:$0xff] %v1604_v63  ;;  %1621 = vst [vmem:[%s2706_s10 + $0x18] sm:$0xff] %v1605_v0  ;;  %v1614_v4 = vmax.f32 %v1598_v23, 0.0  ;;  %v1615_v31 = vmax.f32 %v1599_v54, 0.0  ;;  %v1616_v19 = vmax.f32 %v1600_v56, 0.0  ;;  %v1617_v32 = vmax.f32 %v1601_v60, 0.0 }
 0x83f   :  { %1622 = vst [vmem:[%s2706_s10 + $0x20] sm:$0xff] %v1606_v1  ;;  %1623 = vst [vmem:[%s2706_s10 + $0x28] sm:$0xff] %v1607_v24 }
 0x840   :  { %1624 = vst [vmem:[%s2706_s10 + $0x30] sm:$0xff] %v1608_v33  ;;  %1625 = vst [vmem:[%s2706_s10 + $0x38] sm:$0xff] %v1609_v14 }
 0x841   :  { %1626 = vst [vmem:[%s2706_s10 + $0x40] sm:$0xff] %v1610_v13  ;;  %1627 = vst [vmem:[%s2706_s10 + $0x48] sm:$0xff] %v1611_v42 }
 0x842   :  { %1628 = vst [vmem:[%s2706_s10 + $0x50] sm:$0xff] %v1612_v2  ;;  %1629 = vst [vmem:[%s2706_s10 + $0x58] sm:$0xff] %v1613_v18 }
 0x843   :  { %1630 = vst [vmem:[%s2706_s10 + $0x60] sm:$0xff] %v1614_v4  ;;  %1631 = vst [vmem:[%s2706_s10 + $0x68] sm:$0xff] %v1615_v31 }
 0x844   :  { %1632 = vst [vmem:[%s2706_s10 + $0x70] sm:$0xff] %v1616_v19  ;;  %1633 = vst [vmem:[%s2706_s10 + $0x78] sm:$0xff] %v1617_v32 }
 0x845   :  { %1638 = vsyncpa [#allocation3], 1 }

</bundles_post_ra>
